<compile_context>
chip_gen: v6e
topology: v6e:2x2x1
jax: 0.10.0
libtpu: 0.0.40
codegen_flags: <defaults>
</compile_context>

<pallas_src>
import functools

import jax
import jax.numpy as jnp
from jax.experimental import pallas as pl
from jax.experimental.pallas import tpu as pltpu

_LANES = 128


def _mse_partial_kernel(x_ref, t_ref, out_ref, acc_ref, *,
                        steps, row_tile, valid_rows, ragged):
    i = pl.program_id(1)

    @pl.when(i == 0)
    def _():
        acc_ref[...] = jnp.zeros_like(acc_ref)

    x = x_ref[...]
    t = t_ref[...]
    # Static (trace-time) dtype check: only cast when inputs are not f32.
    if x.dtype != jnp.float32:
        x = x.astype(jnp.float32)
    if t.dtype != jnp.float32:
        t = t.astype(jnp.float32)
    d = x - t
    sq = d * d
    if ragged:
        # Rows past `valid_rows` hold unspecified data (partial last block).
        # Select (do not multiply by 0/1) so Inf/NaN garbage is dropped.
        s = pl.program_id(0)
        start = (s * steps + i) * row_tile
        row_ids = start + jax.lax.broadcasted_iota(jnp.int32, sq.shape, 0)
        sq = jnp.where(row_ids < valid_rows, sq, 0.0)
    # Fold (row_tile, 128) -> (8, 128): layout-preserving reshape, pure VPU
    # adds; keeps the accumulator a single vreg and frees vld/vst slots.
    acc_ref[...] += sq.reshape(row_tile // 8, 8, _LANES).sum(axis=0)

    @pl.when(i == pl.num_programs(1) - 1)
    def _():
        out_ref[...] = acc_ref[...]


def _round_up(n, m):
    return ((n + m - 1) // m) * m


def _device_defaults():
    """(num_splits, max_row_tile) tuned per chip generation."""
    try:
        kind = jax.devices()[0].device_kind.lower()
    except Exception:
        kind = ""
    if "v7" in kind:
        # 2 TensorCores; 2 MiB blocks chase the ~3.2 TB/s per-TC roofline.
        return 2, 4096
    # v5e / v6e: single TC, 1 MiB blocks (4 MiB double-buffered, well under
    # the 16 / 32 MiB scoped-VMEM defaults).
    return 1, 2048


def content_loss(x, target, *, num_splits=None, max_row_tile=None,
                 small_input_threshold=1 << 18):
    """Returns (input_passthrough, loss_scalar) matching ContentLoss.forward."""
    assert x.shape == target.shape, "mse_loss requires matching shapes here"
    total = x.size
    d_splits, d_tile = _device_defaults()
    if num_splits is None:
        num_splits = d_splits
    if max_row_tile is None:
        max_row_tile = d_tile

    # Small-input fast path: pallas_call fixed overhead dominates below this.
    if total < small_input_threshold:
        diff = x.astype(jnp.float32) - target.astype(jnp.float32)
        return x, jnp.sum(diff * diff) / jnp.float32(total)

    itemsize = jnp.dtype(x.dtype).itemsize
    sub = max(8, 32 // itemsize)     # sublane multiple: 8 f32, 16 bf16, 32 int8

    flat_x = x.reshape(-1)
    flat_t = target.reshape(-1)
    rows = total // _LANES           # bulk rows handled by the kernel
    bulk = rows * _LANES             # bulk element count (tail < 128 elems)

    row_tile = min(_round_up(max_row_tile, sub), _round_up(rows, sub))
    total_blocks = pl.cdiv(rows, row_tile)
    if total_blocks % num_splits != 0:
        num_splits = 1               # keep every grid step a real block
    steps = total_blocks // num_splits
    ragged = (rows % row_tile) != 0

    bx = flat_x if bulk == total else flat_x[:bulk]
    bt = flat_t if bulk == total else flat_t[:bulk]
    bx = bx.reshape(rows, _LANES)    # copy-free reshape when 128-aligned
    bt = bt.reshape(rows, _LANES)

    kernel = functools.partial(_mse_partial_kernel, steps=steps,
                               row_tile=row_tile, valid_rows=rows,
                               ragged=ragged)

    cost = pl.CostEstimate(
        flops=3 * bulk,
        transcendentals=0,
        bytes_accessed=2 * bulk * itemsize + num_splits * 8 * _LANES * 4,
    )

    partials = pl.pallas_call(
        kernel,
        out_shape=jax.ShapeDtypeStruct((num_splits * 8, _LANES), jnp.float32),
        grid_spec=pltpu.PrefetchScalarGridSpec(
            num_scalar_prefetch=0,
            grid=(num_splits, steps),
            in_specs=[
                pl.BlockSpec((row_tile, _LANES),
                             lambda s, i: (s * steps + i, 0)),
                pl.BlockSpec((row_tile, _LANES),
                             lambda s, i: (s * steps + i, 0)),
            ],
            out_specs=pl.BlockSpec((8, _LANES), lambda s, i: (s, 0)),
            scratch_shapes=[pltpu.VMEM((8, _LANES), jnp.float32)],
        ),
        compiler_params=pltpu.CompilerParams(
            dimension_semantics=("parallel", "arbitrary"),
        ),
        cost_estimate=cost,
    )(bx, bt)

    sq_sum = jnp.sum(partials)
    if bulk != total:
        # Sub-128-element tail: cheaper in plain jnp than padding both tensors.
        tx = flat_x[bulk:].astype(jnp.float32)
        tt = flat_t[bulk:].astype(jnp.float32)
        sq_sum = sq_sum + jnp.sum((tx - tt) ** 2)

    loss = sq_sum / jnp.float32(total)
    # Module returns its input unchanged (loss is stashed as an attribute).
    return x, loss


if __name__ == "__main__":
    key = jax.random.PRNGKey(0)
    k = jax.random.split(key, 6)

    def reference(a, b):
        return jnp.mean((a.astype(jnp.float32) - b.astype(jnp.float32)) ** 2)

    # 1) Small NCHW demo shape (module-typical): small-input fast path.
    x_small = jax.random.normal(k[0], (2, 4, 16, 16), dtype=jnp.float32)
    t_small = jax.random.normal(k[1], (2, 4, 16, 16), dtype=jnp.float32)
    out_s, loss_s = content_loss(x_small, t_small)
    out_s = jax.block_until_ready(out_s)
    loss_s = jax.block_until_ready(loss_s)
    assert jnp.allclose(loss_s, reference(x_small, t_small),
                        rtol=1e-4, atol=1e-6), "small-shape loss mismatch"
    assert jnp.array_equal(out_s, x_small)

    # 2) Larger 128-aligned feature map: exercises the Pallas kernel path.
    x_big = jax.random.normal(k[2], (2, 64, 64, 64), dtype=jnp.float32)
    t_big = jax.random.normal(k[3], (2, 64, 64, 64), dtype=jnp.float32)
    out_b, loss_b = content_loss(x_big, t_big)
    out_b = jax.block_until_ready(out_b)
    loss_b = jax.block_until_ready(loss_b)
    assert jnp.allclose(loss_b, reference(x_big, t_big),
                        rtol=1e-4, atol=1e-6), "aligned-shape loss mismatch"
    assert jnp.array_equal(out_b, x_big)

    # 3) Non-128-aligned shape: exercises the in-kernel ragged mask + jnp tail.
    x_odd = jax.random.normal(k[4], (3, 37, 65, 67), dtype=jnp.float32)
    t_odd = jax.random.normal(k[5], (3, 37, 65, 67), dtype=jnp.float32)
    out_o, loss_o = content_loss(x_odd, t_odd)
    out_o = jax.block_until_ready(out_o)
    loss_o = jax.block_until_ready(loss_o)
    assert jnp.allclose(loss_o, reference(x_odd, t_odd),
                        rtol=1e-4, atol=1e-6), "ragged-shape loss mismatch"
    assert jnp.array_equal(out_o, x_odd)

    print("KERNEL_OK")
</pallas_src>

<mosaic_0001>
module attributes {stable_mosaic.version = 11 : i64} {
  func.func @_mse_partial_kernel(%arg0: i32, %arg1: i32, %arg2: memref<2048x128xf32, #tpu.memory_space<vmem>>, %arg3: memref<2048x128xf32, #tpu.memory_space<vmem>>, %arg4: memref<8x128xf32, #tpu.memory_space<vmem>>, %arg5: memref<8x128xf32, #tpu.memory_space<vmem>>) attributes {dimension_semantics = [#tpu.dimension_semantics<parallel>, #tpu.dimension_semantics<arbitrary>], iteration_bounds = array<i64: 1, 2>, scalar_prefetch = 0 : i64, scratch_operands = 1 : i64, tpu.core_type = #tpu.core_type<tc>, window_params = [{transform_indices = @transform_0, window_bounds = array<i64: 2048, 128>}, {transform_indices = @transform_1, window_bounds = array<i64: 2048, 128>}, {transform_indices = @transform_2, window_bounds = array<i64: 8, 128>}]} {
    %c0_i32 = arith.constant 0 : i32
    %0 = arith.cmpi eq, %arg1, %c0_i32 : i32
    %1 = arith.extui %0 : i1 to i32
    %c0_i32_0 = arith.constant 0 : i32
    %2 = arith.cmpi ne, %1, %c0_i32_0 : i32
    scf.if %2 {
      %cst_9 = arith.constant 0.000000e+00 : f32
      %15 = vector.broadcast %cst_9 : f32 to vector<8x128xf32>
      %c0_10 = arith.constant 0 : index
      %c0_11 = arith.constant 0 : index
      %16 = vector.load %arg5[%c0_10, %c0_11] : memref<8x128xf32, #tpu.memory_space<vmem>>, vector<8x128xf32>
      tpu.vector_store %arg5[%c0_10, %c0_11], %15 {strides = array<i32>} : memref<8x128xf32, #tpu.memory_space<vmem>>, vector<8x128xf32>,
    } else {
    }
    %c0 = arith.constant 0 : index
    %c0_1 = arith.constant 0 : index
    %3 = vector.load %arg2[%c0, %c0_1] : memref<2048x128xf32, #tpu.memory_space<vmem>>, vector<2048x128xf32>
    %c0_2 = arith.constant 0 : index
    %c0_3 = arith.constant 0 : index
    %4 = vector.load %arg3[%c0_2, %c0_3] : memref<2048x128xf32, #tpu.memory_space<vmem>>, vector<2048x128xf32>
    %5 = arith.subf %3, %4 : vector<2048x128xf32>
    %6 = arith.mulf %5, %5 : vector<2048x128xf32>
    %c0_4 = arith.constant 0 : index
    %c0_5 = arith.constant 0 : index
    %7 = vector.load %arg5[%c0_4, %c0_5] : memref<8x128xf32, #tpu.memory_space<vmem>>, vector<8x128xf32>
    %8 = vector.shape_cast %6 : vector<2048x128xf32> to vector<256x8x128xf32>
    %cst = arith.constant dense<0.000000e+00> : vector<8x128xf32>
    %9 = vector.multi_reduction <add>, %8, %cst [0] : vector<256x8x128xf32> to vector<8x128xf32>
    %10 = arith.addf %7, %9 : vector<8x128xf32>
    %c0_6 = arith.constant 0 : index
    %c0_7 = arith.constant 0 : index
    %11 = vector.load %arg5[%c0_6, %c0_7] : memref<8x128xf32, #tpu.memory_space<vmem>>, vector<8x128xf32>
    tpu.vector_store %arg5[%c0_6, %c0_7], %10 {strides = array<i32>} : memref<8x128xf32, #tpu.memory_space<vmem>>, vector<8x128xf32>,
    %c1_i32 = arith.constant 1 : i32
    %12 = arith.cmpi eq, %arg1, %c1_i32 : i32
    %13 = arith.extui %12 : i1 to i32
    %c0_i32_8 = arith.constant 0 : i32
    %14 = arith.cmpi ne, %13, %c0_i32_8 : i32
    scf.if %14 {
      %c0_9 = arith.constant 0 : index
      %c0_10 = arith.constant 0 : index
      %15 = vector.load %arg5[%c0_9, %c0_10] : memref<8x128xf32, #tpu.memory_space<vmem>>, vector<8x128xf32>
      %c0_11 = arith.constant 0 : index
      %c0_12 = arith.constant 0 : index
      %16 = vector.load %arg4[%c0_11, %c0_12] : memref<8x128xf32, #tpu.memory_space<vmem>>, vector<8x128xf32>
      tpu.vector_store %arg4[%c0_11, %c0_12], %15 {strides = array<i32>} : memref<8x128xf32, #tpu.memory_space<vmem>>, vector<8x128xf32>,
    } else {
    }
    return
  }
  func.func @transform_0(%arg0: i32, %arg1: i32) -> (i32, i32) {
    %c2_i32 = arith.constant 2 : i32
    %0 = arith.muli %arg0, %c2_i32 : i32
    %1 = arith.addi %0, %arg1 : i32
    %c0_i32 = arith.constant 0 : i32
    %c0_i32_0 = arith.constant 0 : i32
    return %1, %c0_i32 : i32, i32
  }
  func.func @transform_1(%arg0: i32, %arg1: i32) -> (i32, i32) {
    %c2_i32 = arith.constant 2 : i32
    %0 = arith.muli %arg0, %c2_i32 : i32
    %1 = arith.addi %0, %arg1 : i32
    %c0_i32 = arith.constant 0 : i32
    %c0_i32_0 = arith.constant 0 : i32
    return %1, %c0_i32 : i32, i32
  }
  func.func @transform_2(%arg0: i32, %arg1: i32) -> (i32, i32) {
    %c0_i32 = arith.constant 0 : i32
    %c0_i32_0 = arith.constant 0 : i32
    return %arg0, %c0_i32 : i32, i32
  }
}

</mosaic_0001>

<bundles_post_ra>
// kernel: tpu_custom_call.1
= control target key start
LH: loop header
LB: loop body
LE: loop exit
PB: predicated region body
PF: predicated region fallthrough
CT: control target
= control target key end

     0   :  { %7 = vsyncpa [#allocation4], 0  ;;  %s2524_s0 = inlined_call_operand.hbm [shape: f32[4096,128], index: 0, kind: input, shape index: {}]   ;;  %s2525_s1 = inlined_call_operand.hbm [shape: f32[4096,128], index: 1, kind: input, shape index: {}]   ;;  %s2526_s2 = inlined_call_operand.hbm [shape: f32[8,128], index: 2, kind: output, shape index: {}]  }
   0x1   :  { %9 = vsyncpa [#allocation4 + $0x1], 0 }
   0x2   :  { %10 = vsyncpa [#allocation7], 0 }
   0x3   :  { %12 = vsyncpa [#allocation7 + $0x1], 0 }
   0x4   :  { %13 = vsyncpa [#allocation5], 0  ;;  %s1866_s9 = smov 0   ;;  %s1868_s10 = smov 0  }
   0x5   :  { %s1870_s11 = smov 0   ;;  %s1872_s12 = smov 0  }
   0x6   :  { %s1874_s13 = smov 0   ;;  %s1876_s14 = smov 0  }
   0x7 LB: > { %s1615_s15 = sadd.s32 4294967295, %s1843_s14   ;;  %s28_s16 = sadd.s32 1, %s1839_s13  ;;  %s1843_s14 = sphi %s1876_s14, %s19_s14   ;;  %s1839_s13 = sphi %s1874_s13, %s2536_s13   ;;  %s1835_s12 = sphi %s1872_s12, %s2535_s12   ;;  %s1831_s11 = sphi %s1870_s11, %s2534_s11   ;;  %s1827_s10 = sphi %s1868_s10, %s2533_s10   ;;  %s1823_s9 = sphi %s1866_s9, %s2532_s9  }
   0x8   : > { %p29_p0 = scmp.ge.s32.totalorder %s28_s16, 2  ;;  %s42_s17 = sadd.s32 1, %s1831_s11 }
   0x9   : > { %p49_p1 = scmp.ne.s32.totalorder %s1831_s11, %s1827_s10  ;;  %p50_p2 = scmp.eq.s32.totalorder %s1843_s14, 0 }
   0xa   : > { %s2538_s16 = smov (%p29_p0, %s28_s16), 0  ;;  %p55_p4 = scmp.ne.s32.totalorder %s1827_s10, %s1823_s9 }
   0xb   : > { %p1902_p3 = por %p50_p2, %p49_p1  ;;  %s39_s19 = ssub.s32 %s1839_s13, %s2538_s16 }
   0xc   : > { %p56_p5 = scmp.eq.s32.totalorder %s1615_s15, 0  ;;  %p40_p6 = scmp.eq.s32.totalorder %s39_s19, 0 }
   0xd   : > { %p1650_p8 = scmp.lt.s32.totalorder %s1843_s14, 2  ;;  %s1920_s22 = sand.u32 1, %s1831_s11  }
   0xe   : > { %p1911_p7 = por %p56_p5, %p55_p4  ;;  %s1633_s23 = sshll.u32 %s1839_s13, 15 }
   0xf   : > { %s1917_s21 = scalar_select %p40_p6, %s1831_s11, %s42_s17  }
  0x10   : > { %s1618_s24 = sshll.u32 %s1920_s22, 11  ;;  %s147_s27 = scalar_lea.hbm %s2524_s0, %s1633_s23 }
  0x11   : > { %s139_s28 = scalar_lea.vmem [#allocation3], %s1618_s24  ;;  %p1931_p9 = pnand %p1650_p8, %p1902_p3 }
  0x12   : > { %s148_s29 = sshll.u32 %s139_s28, 4  ;;  %s136_s3 = scalar_lea.sflag [#allocation4], %s1920_s22  ;;  %s149_s29 = int_to_ptr.vmem [resolvable:$true] %s148_s29 }
  0x13   : > { %p1707_p10 = pneg %p1931_p9  ;;  %s1718_s4 = scalar_lea.vmem %s149_s29, 32768 }
  0x14   : > { %p1719_p11 = scmp.ne.s32.totalorder %s149_s29, %s1718_s4  ;;  %s1845_s5 = smov [#allocation3]  }
  0x15   : > { %s1723_s6 = sshll.u32 %s1845_s5, 4  ;;  %s1724_s6 = int_to_ptr.vmem [resolvable:$false] %s1723_s6 }
  0x16   : > { %p1721_p12 = pnand %p1719_p11, %p1707_p10  ;;  %s1725_s7 = scalar_lea.vmem %s1724_s6, 65536 }
  0x17   : > { %p1726_p0 = scmp.lt.s32.totalorder %s149_s29, %s1724_s6  ;;  %p1727_p1 = scmp.lt.s32.totalorder %s1725_s7, %s1718_s4 }
  0x18   : > { %p1722_p13 = pneg %p1721_p12 }
  0x19   : > { %p1728_p2 = por %p1727_p1, %p1726_p0 }
  0x1b   : > { %p1729_p3 = pnand %p1728_p2, %p1722_p13 }
  0x1d   : > { %1732 = shalt.err (!%p1729_p3)
}
  0x1e   : > { %s1846_s8 = smov 128   ;;  %s1847_s9 = smov 8  }
  0x1f   : > { %1646 = dma.hbm_to_vmem [thread:$0]  (!%p1931_p9), %s147_s27, 32768, %s149_s29, %s136_s3, %s1846_s8, %s1846_s8, %s1847_s9  }
  0x20   : > { %p1624_p4 = scmp.ge.s32.totalorder %s1843_s14, 1  ;;  %p179_p5 = scmp.lt.s32.totalorder %s1843_s14, 3 }
  0x21   : > { %s170_s25 = scalar_lea.hbm %s2525_s1, %s1633_s23  ;;  %s162_s26 = scalar_lea.vmem [#allocation6], %s1618_s24 }
  0x22   : > { %p1945_p6 = pnand %p1624_p4, %p179_p5  ;;  %s171_s28 = sshll.u32 %s162_s26, 4  ;;  %s172_s28 = int_to_ptr.vmem [resolvable:$true] %s171_s28 }
  0x23   : > { %s159_s4 = scalar_lea.sflag [#allocation7], %s1920_s22  ;;  %s1746_s5 = scalar_lea.vmem %s172_s28, 32768 }
  0x24   : > { %p1747_p8 = scmp.ne.s32.totalorder %s172_s28, %s1746_s5  ;;  %s1848_s27 = smov [#allocation6]  }
  0x25   : > { %s1751_s29 = sshll.u32 %s1848_s27, 4  ;;  %s1752_s29 = int_to_ptr.vmem [resolvable:$false] %s1751_s29 }
  0x26   : > { %p1749_p11 = pnand %p1747_p8, %p1707_p10  ;;  %s1753_s3 = scalar_lea.vmem %s1752_s29, 65536 }
  0x27   : > { %p1754_p13 = scmp.lt.s32.totalorder %s172_s28, %s1752_s29  ;;  %p1755_p0 = scmp.lt.s32.totalorder %s1753_s3, %s1746_s5 }
  0x28   : > { %p1750_p12 = pneg %p1749_p11 }
  0x29   : > { %p1756_p1 = por %p1755_p0, %p1754_p13 }
  0x2b   : > { %p1757_p2 = pnand %p1756_p1, %p1750_p12 }
  0x2d   : > { %1760 = shalt.err (!%p1757_p2)
}
  0x2e   : > { %1649 = dma.hbm_to_vmem [thread:$0]  (!%p1931_p9), %s170_s25, 32768, %s172_s28, %s159_s4, %s1846_s8, %s1846_s8, %s1847_s9  }
  0x2f   : > { %183 = sbr.rel (%p1945_p6) target bundleno = 606 (0x25e), region = 28  ;;  %s185_s22 = sand.u32 (!%p1945_p6), 1, %s1827_s10  }
  0x30   : > { %s1625_s23 = sshll.u32 (!%p1945_p6), %s185_s22, 11  ;;  %s186_s24 = scalar_lea.sflag (!%p1945_p6), [#allocation4], %s185_s22 }
  0x31   : > { %s1963_s6 = scalar_lea.vmem (!%p1945_p6), [#allocation3], %s1625_s23 }
  0x34   : > { %1810 = dma.done.wait (%p1911_p7), %s186_s24, 32768  }
  0x35   : > { %1812 = vsyncadd (%p1911_p7), %s186_s24, 4294934528  ;;  %s195_s7 = scalar_lea.sflag [#allocation7], %s185_s22  ;;  %s1969_s18 = scalar_lea.vmem [#allocation6], %s1625_s23 }
  0x36   : > { %1814 = dma.done.wait (%p1911_p7), %s195_s7, 32768  }
  0x37   : > { %1816 = vsyncadd (%p1911_p7), %s195_s7, 4294934528  ;;  %p1627_p9 = scmp.ne.s32.totalorder %s1835_s12, 0 }
  0x39   : > { %228 = sbr.rel (%p1627_p9) target bundleno = 64 (0x40), region = 40 }
  0x3e   : > { %v1849_v0 = vmov 0.0  }
  0x3f   : > { %229 = vst [vmem:[#allocation2] sm:$0xff] %v1849_v0 }
  0x40 PF: > { %v230_v1 = vld [vmem:[%s1963_s6] sm:$0xff]  ;;  %v231_v2 = vld [vmem:[%s1963_s6 + $0x8] sm:$0xff]  ;;  %v232_v5 = vld [vmem:[%s1963_s6 + $0x10] sm:$0xff]  ;;  %p1628_p7 = scmp.ne.s32.totalorder %s1835_s12, 1 }
  0x41   : > { %v486_v3 = vld [vmem:[%s1969_s18] sm:$0xff]  ;;  %v487_v4 = vld [vmem:[%s1969_s18 + $0x8] sm:$0xff]  ;;  %v488_v6 = vld [vmem:[%s1969_s18 + $0x10] sm:$0xff] }
  0x42   : > { %v742_v7 = vsub.f32 %v230_v1, %v486_v3  ;;  %v743_v8 = vsub.f32 %v231_v2, %v487_v4  ;;  %v233_v9 = vld [vmem:[%s1963_s6 + $0x18] sm:$0xff]  ;;  %v744_v11 = vsub.f32 %v232_v5, %v488_v6  ;;  %v234_v12 = vld [vmem:[%s1963_s6 + $0x20] sm:$0xff]  ;;  %v235_v17 = vld [vmem:[%s1963_s6 + $0x28] sm:$0xff] }
  0x43   : > { %v489_v10 = vld [vmem:[%s1969_s18 + $0x18] sm:$0xff]  ;;  %v490_v13 = vld [vmem:[%s1969_s18 + $0x20] sm:$0xff]  ;;  %v491_v18 = vld [vmem:[%s1969_s18 + $0x28] sm:$0xff] }
  0x44   : > { %v745_v14 = vsub.f32 %v233_v9, %v489_v10  ;;  %v998_v15 = vmul.f32 %v742_v7, %v742_v7  ;;  %v999_v16 = vmul.f32 %v743_v8, %v743_v8  ;;  %v746_v19 = vsub.f32 %v234_v12, %v490_v13  ;;  %v236_v21 = vld [vmem:[%s1963_s6 + $0x30] sm:$0xff]  ;;  %v237_v26 = vld [vmem:[%s1963_s6 + $0x38] sm:$0xff]  ;;  %v238_v31 = vld [vmem:[%s1963_s6 + $0x40] sm:$0xff] }
  0x45   : > { %v1000_v20 = vmul.f32 %v744_v11, %v744_v11  ;;  %v492_v22 = vld [vmem:[%s1969_s18 + $0x30] sm:$0xff]  ;;  %v747_v23 = vsub.f32 %v235_v17, %v491_v18  ;;  %v493_v27 = vld [vmem:[%s1969_s18 + $0x38] sm:$0xff]  ;;  %v494_v32 = vld [vmem:[%s1969_s18 + $0x40] sm:$0xff] }
  0x46   : > { %v1001_v24 = vmul.f32 %v745_v14, %v745_v14  ;;  %v1255_v25 = vadd.f32 %v999_v16, %v998_v15  ;;  %v748_v28 = vsub.f32 %v236_v21, %v492_v22  ;;  %v1002_v29 = vmul.f32 %v746_v19, %v746_v19  ;;  %v239_v36 = vld [vmem:[%s1963_s6 + $0x48] sm:$0xff]  ;;  %v240_v41 = vld [vmem:[%s1963_s6 + $0x50] sm:$0xff]  ;;  %v241_v46 = vld [vmem:[%s1963_s6 + $0x58] sm:$0xff] }
  0x47   : > { %v749_v33 = vsub.f32 %v237_v26, %v493_v27  ;;  %v1003_v34 = vmul.f32 %v747_v23, %v747_v23  ;;  %v495_v37 = vld [vmem:[%s1969_s18 + $0x48] sm:$0xff]  ;;  %v750_v38 = vsub.f32 %v238_v31, %v494_v32  ;;  %v496_v42 = vld [vmem:[%s1969_s18 + $0x50] sm:$0xff]  ;;  %v497_v47 = vld [vmem:[%s1969_s18 + $0x58] sm:$0xff] }
  0x48   : > { %v1256_v30 = vadd.f32 %v1255_v25, %v1000_v20  ;;  %v1004_v39 = vmul.f32 %v748_v28, %v748_v28  ;;  %v751_v43 = vsub.f32 %v239_v36, %v495_v37  ;;  %v752_v48 = vsub.f32 %v240_v41, %v496_v42  ;;  %v242_v51 = vld [vmem:[%s1963_s6 + $0x60] sm:$0xff]  ;;  %v243_v56 = vld [vmem:[%s1963_s6 + $0x68] sm:$0xff]  ;;  %v244_v61 = vld [vmem:[%s1963_s6 + $0x70] sm:$0xff] }
  0x49   : > { %v1005_v44 = vmul.f32 %v749_v33, %v749_v33  ;;  %v1006_v49 = vmul.f32 %v750_v38, %v750_v38  ;;  %v498_v52 = vld [vmem:[%s1969_s18 + $0x60] sm:$0xff]  ;;  %v753_v53 = vsub.f32 %v241_v46, %v497_v47  ;;  %v499_v57 = vld [vmem:[%s1969_s18 + $0x68] sm:$0xff]  ;;  %v500_v62 = vld [vmem:[%s1969_s18 + $0x70] sm:$0xff] }
  0x4a   : > { %v1257_v35 = vadd.f32 %v1256_v30, %v1001_v24  ;;  %v1007_v54 = vmul.f32 %v751_v43, %v751_v43  ;;  %v754_v58 = vsub.f32 %v242_v51, %v498_v52  ;;  %v1008_v59 = vmul.f32 %v752_v48, %v752_v48  ;;  %v245_v2 = vld [vmem:[%s1963_s6 + $0x78] sm:$0xff]  ;;  %v246_v7 = vld [vmem:[%s1963_s6 + $0x80] sm:$0xff]  ;;  %v247_v12 = vld [vmem:[%s1963_s6 + $0x88] sm:$0xff] }
  0x4b   : > { %v755_v63 = vsub.f32 %v243_v56, %v499_v57  ;;  %v1009_v0 = vmul.f32 %v753_v53, %v753_v53  ;;  %v501_v3 = vld [vmem:[%s1969_s18 + $0x78] sm:$0xff]  ;;  %v756_v4 = vsub.f32 %v244_v61, %v500_v62  ;;  %v502_v8 = vld [vmem:[%s1969_s18 + $0x80] sm:$0xff]  ;;  %v503_v13 = vld [vmem:[%s1969_s18 + $0x88] sm:$0xff] }
  0x4c   : > { %v1258_v40 = vadd.f32 %v1257_v35, %v1002_v29  ;;  %v1010_v5 = vmul.f32 %v754_v58, %v754_v58  ;;  %v757_v9 = vsub.f32 %v245_v2, %v501_v3  ;;  %v758_v14 = vsub.f32 %v246_v7, %v502_v8  ;;  %v248_v17 = vld [vmem:[%s1963_s6 + $0x90] sm:$0xff]  ;;  %v249_v22 = vld [vmem:[%s1963_s6 + $0x98] sm:$0xff]  ;;  %v250_v27 = vld [vmem:[%s1963_s6 + $0xa0] sm:$0xff] }
  0x4d   : > { %v1011_v10 = vmul.f32 %v755_v63, %v755_v63  ;;  %v1012_v15 = vmul.f32 %v756_v4, %v756_v4  ;;  %v504_v18 = vld [vmem:[%s1969_s18 + $0x90] sm:$0xff]  ;;  %v759_v19 = vsub.f32 %v247_v12, %v503_v13  ;;  %v505_v23 = vld [vmem:[%s1969_s18 + $0x98] sm:$0xff]  ;;  %v506_v28 = vld [vmem:[%s1969_s18 + $0xa0] sm:$0xff] }
  0x4e   : > { %v1259_v45 = vadd.f32 %v1258_v40, %v1003_v34  ;;  %v1013_v20 = vmul.f32 %v757_v9, %v757_v9  ;;  %v760_v24 = vsub.f32 %v248_v17, %v504_v18  ;;  %v1014_v25 = vmul.f32 %v758_v14, %v758_v14  ;;  %v251_v32 = vld [vmem:[%s1963_s6 + $0xa8] sm:$0xff]  ;;  %v252_v37 = vld [vmem:[%s1963_s6 + $0xb0] sm:$0xff]  ;;  %v253_v42 = vld [vmem:[%s1963_s6 + $0xb8] sm:$0xff] }
  0x4f   : > { %v761_v29 = vsub.f32 %v249_v22, %v505_v23  ;;  %v1015_v30 = vmul.f32 %v759_v19, %v759_v19  ;;  %v507_v33 = vld [vmem:[%s1969_s18 + $0xa8] sm:$0xff]  ;;  %v762_v34 = vsub.f32 %v250_v27, %v506_v28  ;;  %v508_v38 = vld [vmem:[%s1969_s18 + $0xb0] sm:$0xff]  ;;  %v509_v43 = vld [vmem:[%s1969_s18 + $0xb8] sm:$0xff] }
  0x50   : > { %v1260_v50 = vadd.f32 %v1259_v45, %v1004_v39  ;;  %v1016_v35 = vmul.f32 %v760_v24, %v760_v24  ;;  %v763_v39 = vsub.f32 %v251_v32, %v507_v33  ;;  %v254_v47 = vld [vmem:[%s1963_s6 + $0xc0] sm:$0xff]  ;;  %v255_v52 = vld [vmem:[%s1963_s6 + $0xc8] sm:$0xff]  ;;  %v256_v57 = vld [vmem:[%s1963_s6 + $0xd0] sm:$0xff] }
  0x51   : > { %v1017_v40 = vmul.f32 %v761_v29, %v761_v29  ;;  %v1018_v45 = vmul.f32 %v762_v34, %v762_v34  ;;  %v510_v48 = vld [vmem:[%s1969_s18 + $0xc0] sm:$0xff]  ;;  %v511_v53 = vld [vmem:[%s1969_s18 + $0xc8] sm:$0xff]  ;;  %v512_v58 = vld [vmem:[%s1969_s18 + $0xd0] sm:$0xff] }
  0x52   : > { %v1261_v55 = vadd.f32 %v1260_v50, %v1005_v44  ;;  %v764_v44 = vsub.f32 %v252_v37, %v508_v38  ;;  %v1019_v50 = vmul.f32 %v763_v39, %v763_v39  ;;  %v257_v62 = vld [vmem:[%s1963_s6 + $0xd8] sm:$0xff]  ;;  %v258_v3 = vld [vmem:[%s1963_s6 + $0xe0] sm:$0xff]  ;;  %v259_v8 = vld [vmem:[%s1963_s6 + $0xe8] sm:$0xff] }
  0x53   : > { %v513_v63 = vld [vmem:[%s1969_s18 + $0xd8] sm:$0xff]  ;;  %v514_v4 = vld [vmem:[%s1969_s18 + $0xe0] sm:$0xff]  ;;  %v515_v9 = vld [vmem:[%s1969_s18 + $0xe8] sm:$0xff] }
  0x54   : > { %v1262_v60 = vadd.f32 %v1261_v55, %v1006_v49  ;;  %v765_v49 = vsub.f32 %v253_v42, %v509_v43  ;;  %v1020_v55 = vmul.f32 %v764_v44, %v764_v44  ;;  %v260_v13 = vld [vmem:[%s1963_s6 + $0xf0] sm:$0xff]  ;;  %v261_v18 = vld [vmem:[%s1963_s6 + $0xf8] sm:$0xff]  ;;  %v262_v23 = vld [vmem:[%s1963_s6 + $0x100] sm:$0xff] }
  0x55   : > { %v516_v14 = vld [vmem:[%s1969_s18 + $0xf0] sm:$0xff]  ;;  %v517_v19 = vld [vmem:[%s1969_s18 + $0xf8] sm:$0xff]  ;;  %v518_v24 = vld [vmem:[%s1969_s18 + $0x100] sm:$0xff] }
  0x56   : > { %v1263_v1 = vadd.f32 %v1262_v60, %v1007_v54  ;;  %v766_v54 = vsub.f32 %v254_v47, %v510_v48  ;;  %v1021_v60 = vmul.f32 %v765_v49, %v765_v49  ;;  %v263_v28 = vld [vmem:[%s1963_s6 + $0x108] sm:$0xff]  ;;  %v264_v33 = vld [vmem:[%s1963_s6 + $0x110] sm:$0xff]  ;;  %v265_v38 = vld [vmem:[%s1963_s6 + $0x118] sm:$0xff] }
  0x57   : > { %v519_v29 = vld [vmem:[%s1969_s18 + $0x108] sm:$0xff]  ;;  %v520_v34 = vld [vmem:[%s1969_s18 + $0x110] sm:$0xff]  ;;  %v521_v39 = vld [vmem:[%s1969_s18 + $0x118] sm:$0xff] }
  0x58   : > { %v1264_v6 = vadd.f32 %v1263_v1, %v1008_v59  ;;  %v767_v59 = vsub.f32 %v255_v52, %v511_v53  ;;  %v1022_v1 = vmul.f32 %v766_v54, %v766_v54  ;;  %v266_v43 = vld [vmem:[%s1963_s6 + $0x120] sm:$0xff]  ;;  %v267_v48 = vld [vmem:[%s1963_s6 + $0x128] sm:$0xff]  ;;  %v268_v53 = vld [vmem:[%s1963_s6 + $0x130] sm:$0xff] }
  0x59   : > { %v522_v44 = vld [vmem:[%s1969_s18 + $0x120] sm:$0xff]  ;;  %v523_v49 = vld [vmem:[%s1969_s18 + $0x128] sm:$0xff]  ;;  %v524_v54 = vld [vmem:[%s1969_s18 + $0x130] sm:$0xff] }
  0x5a   : > { %v1265_v11 = vadd.f32 %v1264_v6, %v1009_v0  ;;  %v768_v0 = vsub.f32 %v256_v57, %v512_v58  ;;  %v1023_v6 = vmul.f32 %v767_v59, %v767_v59  ;;  %v269_v58 = vld [vmem:[%s1963_s6 + $0x138] sm:$0xff] }
  0x5b   : > { %v525_v59 = vld [vmem:[%s1969_s18 + $0x138] sm:$0xff] }
  0x5c   : > { %v1266_v16 = vadd.f32 %v1265_v11, %v1010_v5  ;;  %v769_v5 = vsub.f32 %v257_v62, %v513_v63  ;;  %v1024_v11 = vmul.f32 %v768_v0, %v768_v0  ;;  %v270_v63 = vld [vmem:[%s1963_s6 + $0x140] sm:$0xff] }
  0x5d   : > { %v526_v0 = vld [vmem:[%s1969_s18 + $0x140] sm:$0xff] }
  0x5e   : > { %v1267_v21 = vadd.f32 %v1266_v16, %v1011_v10  ;;  %v770_v10 = vsub.f32 %v258_v3, %v514_v4  ;;  %v1025_v16 = vmul.f32 %v769_v5, %v769_v5  ;;  %v271_v4 = vld [vmem:[%s1963_s6 + $0x148] sm:$0xff] }
  0x5f   : > { %v527_v5 = vld [vmem:[%s1969_s18 + $0x148] sm:$0xff] }
  0x60   : > { %v1268_v26 = vadd.f32 %v1267_v21, %v1012_v15  ;;  %v771_v15 = vsub.f32 %v259_v8, %v515_v9  ;;  %v1026_v21 = vmul.f32 %v770_v10, %v770_v10  ;;  %v272_v9 = vld [vmem:[%s1963_s6 + $0x150] sm:$0xff] }
  0x61   : > { %v528_v10 = vld [vmem:[%s1969_s18 + $0x150] sm:$0xff] }
  0x62   : > { %v1269_v31 = vadd.f32 %v1268_v26, %v1013_v20  ;;  %v772_v20 = vsub.f32 %v260_v13, %v516_v14  ;;  %v1027_v26 = vmul.f32 %v771_v15, %v771_v15  ;;  %v273_v14 = vld [vmem:[%s1963_s6 + $0x158] sm:$0xff] }
  0x63   : > { %v529_v15 = vld [vmem:[%s1969_s18 + $0x158] sm:$0xff] }
  0x64   : > { %v1270_v36 = vadd.f32 %v1269_v31, %v1014_v25  ;;  %v773_v25 = vsub.f32 %v261_v18, %v517_v19  ;;  %v1028_v31 = vmul.f32 %v772_v20, %v772_v20  ;;  %v274_v19 = vld [vmem:[%s1963_s6 + $0x160] sm:$0xff] }
  0x65   : > { %v530_v20 = vld [vmem:[%s1969_s18 + $0x160] sm:$0xff] }
  0x66   : > { %v1271_v41 = vadd.f32 %v1270_v36, %v1015_v30  ;;  %v774_v30 = vsub.f32 %v262_v23, %v518_v24  ;;  %v1029_v36 = vmul.f32 %v773_v25, %v773_v25  ;;  %v275_v24 = vld [vmem:[%s1963_s6 + $0x168] sm:$0xff] }
  0x67   : > { %v531_v25 = vld [vmem:[%s1969_s18 + $0x168] sm:$0xff] }
  0x68   : > { %v1272_v46 = vadd.f32 %v1271_v41, %v1016_v35  ;;  %v775_v35 = vsub.f32 %v263_v28, %v519_v29  ;;  %v1030_v41 = vmul.f32 %v774_v30, %v774_v30  ;;  %v276_v29 = vld [vmem:[%s1963_s6 + $0x170] sm:$0xff] }
  0x69   : > { %v532_v30 = vld [vmem:[%s1969_s18 + $0x170] sm:$0xff] }
  0x6a   : > { %v1273_v51 = vadd.f32 %v1272_v46, %v1017_v40  ;;  %v776_v40 = vsub.f32 %v264_v33, %v520_v34  ;;  %v1031_v46 = vmul.f32 %v775_v35, %v775_v35  ;;  %v277_v34 = vld [vmem:[%s1963_s6 + $0x178] sm:$0xff] }
  0x6b   : > { %v533_v35 = vld [vmem:[%s1969_s18 + $0x178] sm:$0xff] }
  0x6c   : > { %v1274_v56 = vadd.f32 %v1273_v51, %v1018_v45  ;;  %v777_v45 = vsub.f32 %v265_v38, %v521_v39  ;;  %v1032_v51 = vmul.f32 %v776_v40, %v776_v40  ;;  %v278_v39 = vld [vmem:[%s1963_s6 + $0x180] sm:$0xff] }
  0x6d   : > { %v534_v40 = vld [vmem:[%s1969_s18 + $0x180] sm:$0xff] }
  0x6e   : > { %v1275_v61 = vadd.f32 %v1274_v56, %v1019_v50  ;;  %v778_v50 = vsub.f32 %v266_v43, %v522_v44  ;;  %v1033_v56 = vmul.f32 %v777_v45, %v777_v45  ;;  %v279_v44 = vld [vmem:[%s1963_s6 + $0x188] sm:$0xff] }
  0x6f   : > { %v535_v45 = vld [vmem:[%s1969_s18 + $0x188] sm:$0xff] }
  0x70   : > { %v1276_v2 = vadd.f32 %v1275_v61, %v1020_v55  ;;  %v779_v55 = vsub.f32 %v267_v48, %v523_v49  ;;  %v1034_v61 = vmul.f32 %v778_v50, %v778_v50  ;;  %v280_v49 = vld [vmem:[%s1963_s6 + $0x190] sm:$0xff] }
  0x71   : > { %v536_v50 = vld [vmem:[%s1969_s18 + $0x190] sm:$0xff] }
  0x72   : > { %v1277_v7 = vadd.f32 %v1276_v2, %v1021_v60  ;;  %v780_v60 = vsub.f32 %v268_v53, %v524_v54  ;;  %v1035_v2 = vmul.f32 %v779_v55, %v779_v55  ;;  %v281_v54 = vld [vmem:[%s1963_s6 + $0x198] sm:$0xff] }
  0x73   : > { %v537_v55 = vld [vmem:[%s1969_s18 + $0x198] sm:$0xff] }
  0x74   : > { %v1278_v12 = vadd.f32 %v1277_v7, %v1022_v1  ;;  %v781_v1 = vsub.f32 %v269_v58, %v525_v59  ;;  %v1036_v7 = vmul.f32 %v780_v60, %v780_v60  ;;  %v282_v59 = vld [vmem:[%s1963_s6 + $0x1a0] sm:$0xff] }
  0x75   : > { %v538_v60 = vld [vmem:[%s1969_s18 + $0x1a0] sm:$0xff] }
  0x76   : > { %v1279_v17 = vadd.f32 %v1278_v12, %v1023_v6  ;;  %v782_v6 = vsub.f32 %v270_v63, %v526_v0  ;;  %v1037_v12 = vmul.f32 %v781_v1, %v781_v1  ;;  %v283_v0 = vld [vmem:[%s1963_s6 + $0x1a8] sm:$0xff] }
  0x77   : > { %v539_v1 = vld [vmem:[%s1969_s18 + $0x1a8] sm:$0xff] }
  0x78   : > { %v1280_v22 = vadd.f32 %v1279_v17, %v1024_v11  ;;  %v783_v11 = vsub.f32 %v271_v4, %v527_v5  ;;  %v1038_v17 = vmul.f32 %v782_v6, %v782_v6  ;;  %v284_v5 = vld [vmem:[%s1963_s6 + $0x1b0] sm:$0xff] }
  0x79   : > { %v540_v6 = vld [vmem:[%s1969_s18 + $0x1b0] sm:$0xff] }
  0x7a   : > { %v1281_v27 = vadd.f32 %v1280_v22, %v1025_v16  ;;  %v784_v16 = vsub.f32 %v272_v9, %v528_v10  ;;  %v1039_v22 = vmul.f32 %v783_v11, %v783_v11  ;;  %v285_v10 = vld [vmem:[%s1963_s6 + $0x1b8] sm:$0xff] }
  0x7b   : > { %v541_v11 = vld [vmem:[%s1969_s18 + $0x1b8] sm:$0xff] }
  0x7c   : > { %v1282_v32 = vadd.f32 %v1281_v27, %v1026_v21  ;;  %v785_v21 = vsub.f32 %v273_v14, %v529_v15  ;;  %v1040_v27 = vmul.f32 %v784_v16, %v784_v16  ;;  %v286_v15 = vld [vmem:[%s1963_s6 + $0x1c0] sm:$0xff] }
  0x7d   : > { %v542_v16 = vld [vmem:[%s1969_s18 + $0x1c0] sm:$0xff] }
  0x7e   : > { %v1283_v37 = vadd.f32 %v1282_v32, %v1027_v26  ;;  %v786_v26 = vsub.f32 %v274_v19, %v530_v20  ;;  %v1041_v32 = vmul.f32 %v785_v21, %v785_v21  ;;  %v287_v20 = vld [vmem:[%s1963_s6 + $0x1c8] sm:$0xff] }
  0x7f   : > { %v543_v21 = vld [vmem:[%s1969_s18 + $0x1c8] sm:$0xff] }
  0x80   : > { %v1284_v42 = vadd.f32 %v1283_v37, %v1028_v31  ;;  %v787_v31 = vsub.f32 %v275_v24, %v531_v25  ;;  %v1042_v37 = vmul.f32 %v786_v26, %v786_v26  ;;  %v288_v25 = vld [vmem:[%s1963_s6 + $0x1d0] sm:$0xff] }
  0x81   : > { %v544_v26 = vld [vmem:[%s1969_s18 + $0x1d0] sm:$0xff] }
  0x82   : > { %v1285_v47 = vadd.f32 %v1284_v42, %v1029_v36  ;;  %v788_v36 = vsub.f32 %v276_v29, %v532_v30  ;;  %v1043_v42 = vmul.f32 %v787_v31, %v787_v31  ;;  %v289_v30 = vld [vmem:[%s1963_s6 + $0x1d8] sm:$0xff] }
  0x83   : > { %v545_v31 = vld [vmem:[%s1969_s18 + $0x1d8] sm:$0xff] }
  0x84   : > { %v1286_v52 = vadd.f32 %v1285_v47, %v1030_v41  ;;  %v789_v41 = vsub.f32 %v277_v34, %v533_v35  ;;  %v1044_v47 = vmul.f32 %v788_v36, %v788_v36  ;;  %v290_v35 = vld [vmem:[%s1963_s6 + $0x1e0] sm:$0xff] }
  0x85   : > { %v546_v36 = vld [vmem:[%s1969_s18 + $0x1e0] sm:$0xff] }
  0x86   : > { %v1287_v57 = vadd.f32 %v1286_v52, %v1031_v46  ;;  %v790_v46 = vsub.f32 %v278_v39, %v534_v40  ;;  %v1045_v52 = vmul.f32 %v789_v41, %v789_v41  ;;  %v291_v40 = vld [vmem:[%s1963_s6 + $0x1e8] sm:$0xff] }
  0x87   : > { %v547_v41 = vld [vmem:[%s1969_s18 + $0x1e8] sm:$0xff] }
  0x88   : > { %v1288_v62 = vadd.f32 %v1287_v57, %v1032_v51  ;;  %v791_v51 = vsub.f32 %v279_v44, %v535_v45  ;;  %v1046_v57 = vmul.f32 %v790_v46, %v790_v46  ;;  %v292_v45 = vld [vmem:[%s1963_s6 + $0x1f0] sm:$0xff] }
  0x89   : > { %v548_v46 = vld [vmem:[%s1969_s18 + $0x1f0] sm:$0xff] }
  0x8a   : > { %v1289_v3 = vadd.f32 %v1288_v62, %v1033_v56  ;;  %v792_v56 = vsub.f32 %v280_v49, %v536_v50  ;;  %v1047_v62 = vmul.f32 %v791_v51, %v791_v51  ;;  %v293_v50 = vld [vmem:[%s1963_s6 + $0x1f8] sm:$0xff] }
  0x8b   : > { %v549_v51 = vld [vmem:[%s1969_s18 + $0x1f8] sm:$0xff] }
  0x8c   : > { %v1290_v8 = vadd.f32 %v1289_v3, %v1034_v61  ;;  %v793_v61 = vsub.f32 %v281_v54, %v537_v55  ;;  %v1048_v3 = vmul.f32 %v792_v56, %v792_v56  ;;  %v294_v55 = vld [vmem:[%s1963_s6 + $0x200] sm:$0xff] }
  0x8d   : > { %v550_v56 = vld [vmem:[%s1969_s18 + $0x200] sm:$0xff] }
  0x8e   : > { %v1291_v13 = vadd.f32 %v1290_v8, %v1035_v2  ;;  %v794_v2 = vsub.f32 %v282_v59, %v538_v60  ;;  %v1049_v8 = vmul.f32 %v793_v61, %v793_v61  ;;  %v295_v60 = vld [vmem:[%s1963_s6 + $0x208] sm:$0xff] }
  0x8f   : > { %v551_v61 = vld [vmem:[%s1969_s18 + $0x208] sm:$0xff] }
  0x90   : > { %v1292_v18 = vadd.f32 %v1291_v13, %v1036_v7  ;;  %v795_v7 = vsub.f32 %v283_v0, %v539_v1  ;;  %v1050_v13 = vmul.f32 %v794_v2, %v794_v2  ;;  %v296_v1 = vld [vmem:[%s1963_s6 + $0x210] sm:$0xff] }
  0x91   : > { %v552_v2 = vld [vmem:[%s1969_s18 + $0x210] sm:$0xff] }
  0x92   : > { %v1293_v23 = vadd.f32 %v1292_v18, %v1037_v12  ;;  %v796_v12 = vsub.f32 %v284_v5, %v540_v6  ;;  %v1051_v18 = vmul.f32 %v795_v7, %v795_v7  ;;  %v297_v6 = vld [vmem:[%s1963_s6 + $0x218] sm:$0xff] }
  0x93   : > { %v553_v7 = vld [vmem:[%s1969_s18 + $0x218] sm:$0xff] }
  0x94   : > { %v1294_v28 = vadd.f32 %v1293_v23, %v1038_v17  ;;  %v797_v17 = vsub.f32 %v285_v10, %v541_v11  ;;  %v1052_v23 = vmul.f32 %v796_v12, %v796_v12  ;;  %v298_v11 = vld [vmem:[%s1963_s6 + $0x220] sm:$0xff] }
  0x95   : > { %v554_v12 = vld [vmem:[%s1969_s18 + $0x220] sm:$0xff] }
  0x96   : > { %v1295_v33 = vadd.f32 %v1294_v28, %v1039_v22  ;;  %v798_v22 = vsub.f32 %v286_v15, %v542_v16  ;;  %v1053_v28 = vmul.f32 %v797_v17, %v797_v17  ;;  %v299_v16 = vld [vmem:[%s1963_s6 + $0x228] sm:$0xff] }
  0x97   : > { %v555_v17 = vld [vmem:[%s1969_s18 + $0x228] sm:$0xff] }
  0x98   : > { %v1296_v38 = vadd.f32 %v1295_v33, %v1040_v27  ;;  %v799_v27 = vsub.f32 %v287_v20, %v543_v21  ;;  %v1054_v33 = vmul.f32 %v798_v22, %v798_v22  ;;  %v300_v21 = vld [vmem:[%s1963_s6 + $0x230] sm:$0xff] }
  0x99   : > { %v556_v22 = vld [vmem:[%s1969_s18 + $0x230] sm:$0xff] }
  0x9a   : > { %v1297_v43 = vadd.f32 %v1296_v38, %v1041_v32  ;;  %v800_v32 = vsub.f32 %v288_v25, %v544_v26  ;;  %v1055_v38 = vmul.f32 %v799_v27, %v799_v27  ;;  %v301_v26 = vld [vmem:[%s1963_s6 + $0x238] sm:$0xff] }
  0x9b   : > { %v557_v27 = vld [vmem:[%s1969_s18 + $0x238] sm:$0xff] }
  0x9c   : > { %v1298_v48 = vadd.f32 %v1297_v43, %v1042_v37  ;;  %v801_v37 = vsub.f32 %v289_v30, %v545_v31  ;;  %v1056_v43 = vmul.f32 %v800_v32, %v800_v32  ;;  %v302_v31 = vld [vmem:[%s1963_s6 + $0x240] sm:$0xff] }
  0x9d   : > { %v558_v32 = vld [vmem:[%s1969_s18 + $0x240] sm:$0xff] }
  0x9e   : > { %v1299_v53 = vadd.f32 %v1298_v48, %v1043_v42  ;;  %v802_v42 = vsub.f32 %v290_v35, %v546_v36  ;;  %v1057_v48 = vmul.f32 %v801_v37, %v801_v37  ;;  %v303_v36 = vld [vmem:[%s1963_s6 + $0x248] sm:$0xff] }
  0x9f   : > { %v559_v37 = vld [vmem:[%s1969_s18 + $0x248] sm:$0xff] }
  0xa0   : > { %v1300_v58 = vadd.f32 %v1299_v53, %v1044_v47  ;;  %v803_v47 = vsub.f32 %v291_v40, %v547_v41  ;;  %v1058_v53 = vmul.f32 %v802_v42, %v802_v42  ;;  %v304_v41 = vld [vmem:[%s1963_s6 + $0x250] sm:$0xff] }
  0xa1   : > { %v560_v42 = vld [vmem:[%s1969_s18 + $0x250] sm:$0xff] }
  0xa2   : > { %v1301_v63 = vadd.f32 %v1300_v58, %v1045_v52  ;;  %v804_v52 = vsub.f32 %v292_v45, %v548_v46  ;;  %v1059_v58 = vmul.f32 %v803_v47, %v803_v47  ;;  %v305_v46 = vld [vmem:[%s1963_s6 + $0x258] sm:$0xff] }
  0xa3   : > { %v561_v47 = vld [vmem:[%s1969_s18 + $0x258] sm:$0xff] }
  0xa4   : > { %v1302_v4 = vadd.f32 %v1301_v63, %v1046_v57  ;;  %v805_v57 = vsub.f32 %v293_v50, %v549_v51  ;;  %v1060_v63 = vmul.f32 %v804_v52, %v804_v52  ;;  %v306_v51 = vld [vmem:[%s1963_s6 + $0x260] sm:$0xff] }
  0xa5   : > { %v562_v52 = vld [vmem:[%s1969_s18 + $0x260] sm:$0xff] }
  0xa6   : > { %v1303_v9 = vadd.f32 %v1302_v4, %v1047_v62  ;;  %v806_v62 = vsub.f32 %v294_v55, %v550_v56  ;;  %v1061_v4 = vmul.f32 %v805_v57, %v805_v57  ;;  %v307_v56 = vld [vmem:[%s1963_s6 + $0x268] sm:$0xff] }
  0xa7   : > { %v563_v57 = vld [vmem:[%s1969_s18 + $0x268] sm:$0xff] }
  0xa8   : > { %v1304_v14 = vadd.f32 %v1303_v9, %v1048_v3  ;;  %v807_v3 = vsub.f32 %v295_v60, %v551_v61  ;;  %v1062_v9 = vmul.f32 %v806_v62, %v806_v62  ;;  %v308_v61 = vld [vmem:[%s1963_s6 + $0x270] sm:$0xff] }
  0xa9   : > { %v564_v62 = vld [vmem:[%s1969_s18 + $0x270] sm:$0xff] }
  0xaa   : > { %v1305_v19 = vadd.f32 %v1304_v14, %v1049_v8  ;;  %v808_v8 = vsub.f32 %v296_v1, %v552_v2  ;;  %v1063_v14 = vmul.f32 %v807_v3, %v807_v3  ;;  %v309_v2 = vld [vmem:[%s1963_s6 + $0x278] sm:$0xff] }
  0xab   : > { %v565_v3 = vld [vmem:[%s1969_s18 + $0x278] sm:$0xff] }
  0xac   : > { %v1306_v24 = vadd.f32 %v1305_v19, %v1050_v13  ;;  %v809_v13 = vsub.f32 %v297_v6, %v553_v7  ;;  %v1064_v19 = vmul.f32 %v808_v8, %v808_v8  ;;  %v310_v7 = vld [vmem:[%s1963_s6 + $0x280] sm:$0xff] }
  0xad   : > { %v566_v8 = vld [vmem:[%s1969_s18 + $0x280] sm:$0xff] }
  0xae   : > { %v1307_v29 = vadd.f32 %v1306_v24, %v1051_v18  ;;  %v810_v18 = vsub.f32 %v298_v11, %v554_v12  ;;  %v1065_v24 = vmul.f32 %v809_v13, %v809_v13  ;;  %v311_v12 = vld [vmem:[%s1963_s6 + $0x288] sm:$0xff] }
  0xaf   : > { %v567_v13 = vld [vmem:[%s1969_s18 + $0x288] sm:$0xff] }
  0xb0   : > { %v1308_v34 = vadd.f32 %v1307_v29, %v1052_v23  ;;  %v811_v23 = vsub.f32 %v299_v16, %v555_v17  ;;  %v1066_v29 = vmul.f32 %v810_v18, %v810_v18  ;;  %v312_v17 = vld [vmem:[%s1963_s6 + $0x290] sm:$0xff] }
  0xb1   : > { %v568_v18 = vld [vmem:[%s1969_s18 + $0x290] sm:$0xff] }
  0xb2   : > { %v1309_v39 = vadd.f32 %v1308_v34, %v1053_v28  ;;  %v812_v28 = vsub.f32 %v300_v21, %v556_v22  ;;  %v1067_v34 = vmul.f32 %v811_v23, %v811_v23  ;;  %v313_v22 = vld [vmem:[%s1963_s6 + $0x298] sm:$0xff] }
  0xb3   : > { %v569_v23 = vld [vmem:[%s1969_s18 + $0x298] sm:$0xff] }
  0xb4   : > { %v1310_v44 = vadd.f32 %v1309_v39, %v1054_v33  ;;  %v813_v33 = vsub.f32 %v301_v26, %v557_v27  ;;  %v1068_v39 = vmul.f32 %v812_v28, %v812_v28  ;;  %v314_v27 = vld [vmem:[%s1963_s6 + $0x2a0] sm:$0xff] }
  0xb5   : > { %v570_v28 = vld [vmem:[%s1969_s18 + $0x2a0] sm:$0xff] }
  0xb6   : > { %v1311_v49 = vadd.f32 %v1310_v44, %v1055_v38  ;;  %v814_v38 = vsub.f32 %v302_v31, %v558_v32  ;;  %v1069_v44 = vmul.f32 %v813_v33, %v813_v33  ;;  %v315_v32 = vld [vmem:[%s1963_s6 + $0x2a8] sm:$0xff] }
  0xb7   : > { %v571_v33 = vld [vmem:[%s1969_s18 + $0x2a8] sm:$0xff] }
  0xb8   : > { %v1312_v54 = vadd.f32 %v1311_v49, %v1056_v43  ;;  %v815_v43 = vsub.f32 %v303_v36, %v559_v37  ;;  %v1070_v49 = vmul.f32 %v814_v38, %v814_v38  ;;  %v316_v37 = vld [vmem:[%s1963_s6 + $0x2b0] sm:$0xff] }
  0xb9   : > { %v572_v38 = vld [vmem:[%s1969_s18 + $0x2b0] sm:$0xff] }
  0xba   : > { %v1313_v59 = vadd.f32 %v1312_v54, %v1057_v48  ;;  %v816_v48 = vsub.f32 %v304_v41, %v560_v42  ;;  %v1071_v54 = vmul.f32 %v815_v43, %v815_v43  ;;  %v317_v42 = vld [vmem:[%s1963_s6 + $0x2b8] sm:$0xff] }
  0xbb   : > { %v573_v43 = vld [vmem:[%s1969_s18 + $0x2b8] sm:$0xff] }
  0xbc   : > { %v1314_v0 = vadd.f32 %v1313_v59, %v1058_v53  ;;  %v817_v53 = vsub.f32 %v305_v46, %v561_v47  ;;  %v1072_v59 = vmul.f32 %v816_v48, %v816_v48  ;;  %v318_v47 = vld [vmem:[%s1963_s6 + $0x2c0] sm:$0xff] }
  0xbd   : > { %v574_v48 = vld [vmem:[%s1969_s18 + $0x2c0] sm:$0xff] }
  0xbe   : > { %v1315_v5 = vadd.f32 %v1314_v0, %v1059_v58  ;;  %v818_v58 = vsub.f32 %v306_v51, %v562_v52  ;;  %v1073_v0 = vmul.f32 %v817_v53, %v817_v53  ;;  %v319_v52 = vld [vmem:[%s1963_s6 + $0x2c8] sm:$0xff] }
  0xbf   : > { %v575_v53 = vld [vmem:[%s1969_s18 + $0x2c8] sm:$0xff] }
  0xc0   : > { %v1316_v10 = vadd.f32 %v1315_v5, %v1060_v63  ;;  %v819_v63 = vsub.f32 %v307_v56, %v563_v57  ;;  %v1074_v5 = vmul.f32 %v818_v58, %v818_v58  ;;  %v320_v57 = vld [vmem:[%s1963_s6 + $0x2d0] sm:$0xff] }
  0xc1   : > { %v576_v58 = vld [vmem:[%s1969_s18 + $0x2d0] sm:$0xff] }
  0xc2   : > { %v1317_v15 = vadd.f32 %v1316_v10, %v1061_v4  ;;  %v820_v4 = vsub.f32 %v308_v61, %v564_v62  ;;  %v1075_v10 = vmul.f32 %v819_v63, %v819_v63  ;;  %v321_v62 = vld [vmem:[%s1963_s6 + $0x2d8] sm:$0xff] }
  0xc3   : > { %v577_v63 = vld [vmem:[%s1969_s18 + $0x2d8] sm:$0xff] }
  0xc4   : > { %v1318_v20 = vadd.f32 %v1317_v15, %v1062_v9  ;;  %v821_v9 = vsub.f32 %v309_v2, %v565_v3  ;;  %v1076_v15 = vmul.f32 %v820_v4, %v820_v4  ;;  %v322_v3 = vld [vmem:[%s1963_s6 + $0x2e0] sm:$0xff] }
  0xc5   : > { %v578_v4 = vld [vmem:[%s1969_s18 + $0x2e0] sm:$0xff] }
  0xc6   : > { %v1319_v25 = vadd.f32 %v1318_v20, %v1063_v14  ;;  %v822_v14 = vsub.f32 %v310_v7, %v566_v8  ;;  %v1077_v20 = vmul.f32 %v821_v9, %v821_v9  ;;  %v323_v8 = vld [vmem:[%s1963_s6 + $0x2e8] sm:$0xff] }
  0xc7   : > { %v579_v9 = vld [vmem:[%s1969_s18 + $0x2e8] sm:$0xff] }
  0xc8   : > { %v1320_v30 = vadd.f32 %v1319_v25, %v1064_v19  ;;  %v823_v19 = vsub.f32 %v311_v12, %v567_v13  ;;  %v1078_v25 = vmul.f32 %v822_v14, %v822_v14  ;;  %v324_v13 = vld [vmem:[%s1963_s6 + $0x2f0] sm:$0xff] }
  0xc9   : > { %v580_v14 = vld [vmem:[%s1969_s18 + $0x2f0] sm:$0xff] }
  0xca   : > { %v1321_v35 = vadd.f32 %v1320_v30, %v1065_v24  ;;  %v824_v24 = vsub.f32 %v312_v17, %v568_v18  ;;  %v1079_v30 = vmul.f32 %v823_v19, %v823_v19  ;;  %v325_v18 = vld [vmem:[%s1963_s6 + $0x2f8] sm:$0xff] }
  0xcb   : > { %v581_v19 = vld [vmem:[%s1969_s18 + $0x2f8] sm:$0xff] }
  0xcc   : > { %v1322_v40 = vadd.f32 %v1321_v35, %v1066_v29  ;;  %v825_v29 = vsub.f32 %v313_v22, %v569_v23  ;;  %v1080_v35 = vmul.f32 %v824_v24, %v824_v24  ;;  %v326_v23 = vld [vmem:[%s1963_s6 + $0x300] sm:$0xff] }
  0xcd   : > { %v582_v24 = vld [vmem:[%s1969_s18 + $0x300] sm:$0xff] }
  0xce   : > { %v1323_v45 = vadd.f32 %v1322_v40, %v1067_v34  ;;  %v826_v34 = vsub.f32 %v314_v27, %v570_v28  ;;  %v1081_v40 = vmul.f32 %v825_v29, %v825_v29  ;;  %v327_v28 = vld [vmem:[%s1963_s6 + $0x308] sm:$0xff] }
  0xcf   : > { %v583_v29 = vld [vmem:[%s1969_s18 + $0x308] sm:$0xff] }
  0xd0   : > { %v1324_v50 = vadd.f32 %v1323_v45, %v1068_v39  ;;  %v827_v39 = vsub.f32 %v315_v32, %v571_v33  ;;  %v1082_v45 = vmul.f32 %v826_v34, %v826_v34  ;;  %v328_v33 = vld [vmem:[%s1963_s6 + $0x310] sm:$0xff] }
  0xd1   : > { %v584_v34 = vld [vmem:[%s1969_s18 + $0x310] sm:$0xff] }
  0xd2   : > { %v1325_v55 = vadd.f32 %v1324_v50, %v1069_v44  ;;  %v828_v44 = vsub.f32 %v316_v37, %v572_v38  ;;  %v1083_v50 = vmul.f32 %v827_v39, %v827_v39  ;;  %v329_v38 = vld [vmem:[%s1963_s6 + $0x318] sm:$0xff] }
  0xd3   : > { %v585_v39 = vld [vmem:[%s1969_s18 + $0x318] sm:$0xff] }
  0xd4   : > { %v1326_v60 = vadd.f32 %v1325_v55, %v1070_v49  ;;  %v829_v49 = vsub.f32 %v317_v42, %v573_v43  ;;  %v1084_v55 = vmul.f32 %v828_v44, %v828_v44  ;;  %v330_v43 = vld [vmem:[%s1963_s6 + $0x320] sm:$0xff] }
  0xd5   : > { %v586_v44 = vld [vmem:[%s1969_s18 + $0x320] sm:$0xff] }
  0xd6   : > { %v1327_v1 = vadd.f32 %v1326_v60, %v1071_v54  ;;  %v830_v54 = vsub.f32 %v318_v47, %v574_v48  ;;  %v1085_v60 = vmul.f32 %v829_v49, %v829_v49  ;;  %v331_v48 = vld [vmem:[%s1963_s6 + $0x328] sm:$0xff] }
  0xd7   : > { %v587_v49 = vld [vmem:[%s1969_s18 + $0x328] sm:$0xff] }
  0xd8   : > { %v1328_v6 = vadd.f32 %v1327_v1, %v1072_v59  ;;  %v831_v59 = vsub.f32 %v319_v52, %v575_v53  ;;  %v1086_v1 = vmul.f32 %v830_v54, %v830_v54  ;;  %v332_v53 = vld [vmem:[%s1963_s6 + $0x330] sm:$0xff] }
  0xd9   : > { %v588_v54 = vld [vmem:[%s1969_s18 + $0x330] sm:$0xff] }
  0xda   : > { %v1329_v11 = vadd.f32 %v1328_v6, %v1073_v0  ;;  %v832_v0 = vsub.f32 %v320_v57, %v576_v58  ;;  %v1087_v6 = vmul.f32 %v831_v59, %v831_v59  ;;  %v333_v58 = vld [vmem:[%s1963_s6 + $0x338] sm:$0xff] }
  0xdb   : > { %v589_v59 = vld [vmem:[%s1969_s18 + $0x338] sm:$0xff] }
  0xdc   : > { %v1330_v16 = vadd.f32 %v1329_v11, %v1074_v5  ;;  %v833_v5 = vsub.f32 %v321_v62, %v577_v63  ;;  %v1088_v11 = vmul.f32 %v832_v0, %v832_v0  ;;  %v334_v63 = vld [vmem:[%s1963_s6 + $0x340] sm:$0xff] }
  0xdd   : > { %v590_v0 = vld [vmem:[%s1969_s18 + $0x340] sm:$0xff] }
  0xde   : > { %v1331_v21 = vadd.f32 %v1330_v16, %v1075_v10  ;;  %v834_v10 = vsub.f32 %v322_v3, %v578_v4  ;;  %v1089_v16 = vmul.f32 %v833_v5, %v833_v5  ;;  %v335_v4 = vld [vmem:[%s1963_s6 + $0x348] sm:$0xff] }
  0xdf   : > { %v591_v5 = vld [vmem:[%s1969_s18 + $0x348] sm:$0xff] }
  0xe0   : > { %v1332_v26 = vadd.f32 %v1331_v21, %v1076_v15  ;;  %v835_v15 = vsub.f32 %v323_v8, %v579_v9  ;;  %v1090_v21 = vmul.f32 %v834_v10, %v834_v10  ;;  %v336_v9 = vld [vmem:[%s1963_s6 + $0x350] sm:$0xff] }
  0xe1   : > { %v592_v10 = vld [vmem:[%s1969_s18 + $0x350] sm:$0xff] }
  0xe2   : > { %v1333_v31 = vadd.f32 %v1332_v26, %v1077_v20  ;;  %v836_v20 = vsub.f32 %v324_v13, %v580_v14  ;;  %v1091_v26 = vmul.f32 %v835_v15, %v835_v15  ;;  %v337_v14 = vld [vmem:[%s1963_s6 + $0x358] sm:$0xff] }
  0xe3   : > { %v593_v15 = vld [vmem:[%s1969_s18 + $0x358] sm:$0xff] }
  0xe4   : > { %v1334_v36 = vadd.f32 %v1333_v31, %v1078_v25  ;;  %v837_v25 = vsub.f32 %v325_v18, %v581_v19  ;;  %v1092_v31 = vmul.f32 %v836_v20, %v836_v20  ;;  %v338_v19 = vld [vmem:[%s1963_s6 + $0x360] sm:$0xff] }
  0xe5   : > { %v594_v20 = vld [vmem:[%s1969_s18 + $0x360] sm:$0xff] }
  0xe6   : > { %v1335_v41 = vadd.f32 %v1334_v36, %v1079_v30  ;;  %v838_v30 = vsub.f32 %v326_v23, %v582_v24  ;;  %v1093_v36 = vmul.f32 %v837_v25, %v837_v25  ;;  %v339_v24 = vld [vmem:[%s1963_s6 + $0x368] sm:$0xff] }
  0xe7   : > { %v595_v25 = vld [vmem:[%s1969_s18 + $0x368] sm:$0xff] }
  0xe8   : > { %v1336_v46 = vadd.f32 %v1335_v41, %v1080_v35  ;;  %v839_v35 = vsub.f32 %v327_v28, %v583_v29  ;;  %v1094_v41 = vmul.f32 %v838_v30, %v838_v30  ;;  %v340_v29 = vld [vmem:[%s1963_s6 + $0x370] sm:$0xff] }
  0xe9   : > { %v596_v30 = vld [vmem:[%s1969_s18 + $0x370] sm:$0xff] }
  0xea   : > { %v1337_v51 = vadd.f32 %v1336_v46, %v1081_v40  ;;  %v840_v40 = vsub.f32 %v328_v33, %v584_v34  ;;  %v1095_v46 = vmul.f32 %v839_v35, %v839_v35  ;;  %v341_v34 = vld [vmem:[%s1963_s6 + $0x378] sm:$0xff] }
  0xeb   : > { %v597_v35 = vld [vmem:[%s1969_s18 + $0x378] sm:$0xff] }
  0xec   : > { %v1338_v56 = vadd.f32 %v1337_v51, %v1082_v45  ;;  %v841_v45 = vsub.f32 %v329_v38, %v585_v39  ;;  %v1096_v51 = vmul.f32 %v840_v40, %v840_v40  ;;  %v342_v39 = vld [vmem:[%s1963_s6 + $0x380] sm:$0xff] }
  0xed   : > { %v598_v40 = vld [vmem:[%s1969_s18 + $0x380] sm:$0xff] }
  0xee   : > { %v1339_v61 = vadd.f32 %v1338_v56, %v1083_v50  ;;  %v842_v50 = vsub.f32 %v330_v43, %v586_v44  ;;  %v1097_v56 = vmul.f32 %v841_v45, %v841_v45  ;;  %v343_v44 = vld [vmem:[%s1963_s6 + $0x388] sm:$0xff] }
  0xef   : > { %v599_v45 = vld [vmem:[%s1969_s18 + $0x388] sm:$0xff] }
  0xf0   : > { %v1340_v2 = vadd.f32 %v1339_v61, %v1084_v55  ;;  %v843_v55 = vsub.f32 %v331_v48, %v587_v49  ;;  %v1098_v61 = vmul.f32 %v842_v50, %v842_v50  ;;  %v344_v49 = vld [vmem:[%s1963_s6 + $0x390] sm:$0xff] }
  0xf1   : > { %v600_v50 = vld [vmem:[%s1969_s18 + $0x390] sm:$0xff] }
  0xf2   : > { %v1341_v7 = vadd.f32 %v1340_v2, %v1085_v60  ;;  %v844_v60 = vsub.f32 %v332_v53, %v588_v54  ;;  %v1099_v2 = vmul.f32 %v843_v55, %v843_v55  ;;  %v345_v54 = vld [vmem:[%s1963_s6 + $0x398] sm:$0xff] }
  0xf3   : > { %v601_v55 = vld [vmem:[%s1969_s18 + $0x398] sm:$0xff] }
  0xf4   : > { %v1342_v12 = vadd.f32 %v1341_v7, %v1086_v1  ;;  %v845_v1 = vsub.f32 %v333_v58, %v589_v59  ;;  %v1100_v7 = vmul.f32 %v844_v60, %v844_v60  ;;  %v346_v59 = vld [vmem:[%s1963_s6 + $0x3a0] sm:$0xff] }
  0xf5   : > { %v602_v60 = vld [vmem:[%s1969_s18 + $0x3a0] sm:$0xff] }
  0xf6   : > { %v1343_v17 = vadd.f32 %v1342_v12, %v1087_v6  ;;  %v846_v6 = vsub.f32 %v334_v63, %v590_v0  ;;  %v1101_v12 = vmul.f32 %v845_v1, %v845_v1  ;;  %v347_v0 = vld [vmem:[%s1963_s6 + $0x3a8] sm:$0xff] }
  0xf7   : > { %v603_v1 = vld [vmem:[%s1969_s18 + $0x3a8] sm:$0xff] }
  0xf8   : > { %v1344_v22 = vadd.f32 %v1343_v17, %v1088_v11  ;;  %v847_v11 = vsub.f32 %v335_v4, %v591_v5  ;;  %v1102_v17 = vmul.f32 %v846_v6, %v846_v6  ;;  %v348_v5 = vld [vmem:[%s1963_s6 + $0x3b0] sm:$0xff] }
  0xf9   : > { %v604_v6 = vld [vmem:[%s1969_s18 + $0x3b0] sm:$0xff] }
  0xfa   : > { %v1345_v27 = vadd.f32 %v1344_v22, %v1089_v16  ;;  %v848_v16 = vsub.f32 %v336_v9, %v592_v10  ;;  %v1103_v22 = vmul.f32 %v847_v11, %v847_v11  ;;  %v349_v10 = vld [vmem:[%s1963_s6 + $0x3b8] sm:$0xff] }
  0xfb   : > { %v605_v11 = vld [vmem:[%s1969_s18 + $0x3b8] sm:$0xff] }
  0xfc   : > { %v1346_v32 = vadd.f32 %v1345_v27, %v1090_v21  ;;  %v849_v21 = vsub.f32 %v337_v14, %v593_v15  ;;  %v1104_v27 = vmul.f32 %v848_v16, %v848_v16  ;;  %v350_v15 = vld [vmem:[%s1963_s6 + $0x3c0] sm:$0xff] }
  0xfd   : > { %v606_v16 = vld [vmem:[%s1969_s18 + $0x3c0] sm:$0xff] }
  0xfe   : > { %v1347_v37 = vadd.f32 %v1346_v32, %v1091_v26  ;;  %v850_v26 = vsub.f32 %v338_v19, %v594_v20  ;;  %v1105_v32 = vmul.f32 %v849_v21, %v849_v21  ;;  %v351_v20 = vld [vmem:[%s1963_s6 + $0x3c8] sm:$0xff] }
  0xff   : > { %v607_v21 = vld [vmem:[%s1969_s18 + $0x3c8] sm:$0xff] }
 0x100   : > { %v1348_v42 = vadd.f32 %v1347_v37, %v1092_v31  ;;  %v851_v31 = vsub.f32 %v339_v24, %v595_v25  ;;  %v1106_v37 = vmul.f32 %v850_v26, %v850_v26  ;;  %v352_v25 = vld [vmem:[%s1963_s6 + $0x3d0] sm:$0xff] }
 0x101   : > { %v608_v26 = vld [vmem:[%s1969_s18 + $0x3d0] sm:$0xff] }
 0x102   : > { %v1349_v47 = vadd.f32 %v1348_v42, %v1093_v36  ;;  %v852_v36 = vsub.f32 %v340_v29, %v596_v30  ;;  %v1107_v42 = vmul.f32 %v851_v31, %v851_v31  ;;  %v353_v30 = vld [vmem:[%s1963_s6 + $0x3d8] sm:$0xff] }
 0x103   : > { %v609_v31 = vld [vmem:[%s1969_s18 + $0x3d8] sm:$0xff] }
 0x104   : > { %v1350_v52 = vadd.f32 %v1349_v47, %v1094_v41  ;;  %v853_v41 = vsub.f32 %v341_v34, %v597_v35  ;;  %v1108_v47 = vmul.f32 %v852_v36, %v852_v36  ;;  %v354_v35 = vld [vmem:[%s1963_s6 + $0x3e0] sm:$0xff] }
 0x105   : > { %v610_v36 = vld [vmem:[%s1969_s18 + $0x3e0] sm:$0xff] }
 0x106   : > { %v1351_v57 = vadd.f32 %v1350_v52, %v1095_v46  ;;  %v854_v46 = vsub.f32 %v342_v39, %v598_v40  ;;  %v1109_v52 = vmul.f32 %v853_v41, %v853_v41  ;;  %v355_v40 = vld [vmem:[%s1963_s6 + $0x3e8] sm:$0xff] }
 0x107   : > { %v611_v41 = vld [vmem:[%s1969_s18 + $0x3e8] sm:$0xff] }
 0x108   : > { %v1352_v62 = vadd.f32 %v1351_v57, %v1096_v51  ;;  %v855_v51 = vsub.f32 %v343_v44, %v599_v45  ;;  %v1110_v57 = vmul.f32 %v854_v46, %v854_v46  ;;  %v356_v45 = vld [vmem:[%s1963_s6 + $0x3f0] sm:$0xff] }
 0x109   : > { %v612_v46 = vld [vmem:[%s1969_s18 + $0x3f0] sm:$0xff] }
 0x10a   : > { %v1353_v3 = vadd.f32 %v1352_v62, %v1097_v56  ;;  %v856_v56 = vsub.f32 %v344_v49, %v600_v50  ;;  %v1111_v62 = vmul.f32 %v855_v51, %v855_v51  ;;  %v357_v50 = vld [vmem:[%s1963_s6 + $0x3f8] sm:$0xff] }
 0x10b   : > { %v613_v51 = vld [vmem:[%s1969_s18 + $0x3f8] sm:$0xff] }
 0x10c   : > { %v1354_v8 = vadd.f32 %v1353_v3, %v1098_v61  ;;  %v857_v61 = vsub.f32 %v345_v54, %v601_v55  ;;  %v1112_v3 = vmul.f32 %v856_v56, %v856_v56  ;;  %v358_v55 = vld [vmem:[%s1963_s6 + $0x400] sm:$0xff] }
 0x10d   : > { %v614_v56 = vld [vmem:[%s1969_s18 + $0x400] sm:$0xff] }
 0x10e   : > { %v1355_v13 = vadd.f32 %v1354_v8, %v1099_v2  ;;  %v858_v2 = vsub.f32 %v346_v59, %v602_v60  ;;  %v1113_v8 = vmul.f32 %v857_v61, %v857_v61  ;;  %v359_v60 = vld [vmem:[%s1963_s6 + $0x408] sm:$0xff] }
 0x10f   : > { %v615_v61 = vld [vmem:[%s1969_s18 + $0x408] sm:$0xff] }
 0x110   : > { %v1356_v18 = vadd.f32 %v1355_v13, %v1100_v7  ;;  %v859_v7 = vsub.f32 %v347_v0, %v603_v1  ;;  %v1114_v13 = vmul.f32 %v858_v2, %v858_v2  ;;  %v360_v1 = vld [vmem:[%s1963_s6 + $0x410] sm:$0xff] }
 0x111   : > { %v616_v2 = vld [vmem:[%s1969_s18 + $0x410] sm:$0xff] }
 0x112   : > { %v1357_v23 = vadd.f32 %v1356_v18, %v1101_v12  ;;  %v860_v12 = vsub.f32 %v348_v5, %v604_v6  ;;  %v1115_v18 = vmul.f32 %v859_v7, %v859_v7  ;;  %v361_v6 = vld [vmem:[%s1963_s6 + $0x418] sm:$0xff] }
 0x113   : > { %v617_v7 = vld [vmem:[%s1969_s18 + $0x418] sm:$0xff] }
 0x114   : > { %v1358_v28 = vadd.f32 %v1357_v23, %v1102_v17  ;;  %v861_v17 = vsub.f32 %v349_v10, %v605_v11  ;;  %v1116_v23 = vmul.f32 %v860_v12, %v860_v12  ;;  %v362_v11 = vld [vmem:[%s1963_s6 + $0x420] sm:$0xff] }
 0x115   : > { %v618_v12 = vld [vmem:[%s1969_s18 + $0x420] sm:$0xff] }
 0x116   : > { %v1359_v33 = vadd.f32 %v1358_v28, %v1103_v22  ;;  %v862_v22 = vsub.f32 %v350_v15, %v606_v16  ;;  %v1117_v28 = vmul.f32 %v861_v17, %v861_v17  ;;  %v363_v16 = vld [vmem:[%s1963_s6 + $0x428] sm:$0xff] }
 0x117   : > { %v619_v17 = vld [vmem:[%s1969_s18 + $0x428] sm:$0xff] }
 0x118   : > { %v1360_v38 = vadd.f32 %v1359_v33, %v1104_v27  ;;  %v863_v27 = vsub.f32 %v351_v20, %v607_v21  ;;  %v1118_v33 = vmul.f32 %v862_v22, %v862_v22  ;;  %v364_v21 = vld [vmem:[%s1963_s6 + $0x430] sm:$0xff] }
 0x119   : > { %v620_v22 = vld [vmem:[%s1969_s18 + $0x430] sm:$0xff] }
 0x11a   : > { %v1361_v43 = vadd.f32 %v1360_v38, %v1105_v32  ;;  %v864_v32 = vsub.f32 %v352_v25, %v608_v26  ;;  %v1119_v38 = vmul.f32 %v863_v27, %v863_v27  ;;  %v365_v26 = vld [vmem:[%s1963_s6 + $0x438] sm:$0xff] }
 0x11b   : > { %v621_v27 = vld [vmem:[%s1969_s18 + $0x438] sm:$0xff] }
 0x11c   : > { %v1362_v48 = vadd.f32 %v1361_v43, %v1106_v37  ;;  %v865_v37 = vsub.f32 %v353_v30, %v609_v31  ;;  %v1120_v43 = vmul.f32 %v864_v32, %v864_v32  ;;  %v366_v31 = vld [vmem:[%s1963_s6 + $0x440] sm:$0xff] }
 0x11d   : > { %v622_v32 = vld [vmem:[%s1969_s18 + $0x440] sm:$0xff] }
 0x11e   : > { %v1363_v53 = vadd.f32 %v1362_v48, %v1107_v42  ;;  %v866_v42 = vsub.f32 %v354_v35, %v610_v36  ;;  %v1121_v48 = vmul.f32 %v865_v37, %v865_v37  ;;  %v367_v36 = vld [vmem:[%s1963_s6 + $0x448] sm:$0xff] }
 0x11f   : > { %v623_v37 = vld [vmem:[%s1969_s18 + $0x448] sm:$0xff] }
 0x120   : > { %v1364_v58 = vadd.f32 %v1363_v53, %v1108_v47  ;;  %v867_v47 = vsub.f32 %v355_v40, %v611_v41  ;;  %v1122_v53 = vmul.f32 %v866_v42, %v866_v42  ;;  %v368_v41 = vld [vmem:[%s1963_s6 + $0x450] sm:$0xff] }
 0x121   : > { %v624_v42 = vld [vmem:[%s1969_s18 + $0x450] sm:$0xff] }
 0x122   : > { %v1365_v63 = vadd.f32 %v1364_v58, %v1109_v52  ;;  %v868_v52 = vsub.f32 %v356_v45, %v612_v46  ;;  %v1123_v58 = vmul.f32 %v867_v47, %v867_v47  ;;  %v369_v46 = vld [vmem:[%s1963_s6 + $0x458] sm:$0xff] }
 0x123   : > { %v625_v47 = vld [vmem:[%s1969_s18 + $0x458] sm:$0xff] }
 0x124   : > { %v1366_v4 = vadd.f32 %v1365_v63, %v1110_v57  ;;  %v869_v57 = vsub.f32 %v357_v50, %v613_v51  ;;  %v1124_v63 = vmul.f32 %v868_v52, %v868_v52  ;;  %v370_v51 = vld [vmem:[%s1963_s6 + $0x460] sm:$0xff] }
 0x125   : > { %v626_v52 = vld [vmem:[%s1969_s18 + $0x460] sm:$0xff] }
 0x126   : > { %v1367_v9 = vadd.f32 %v1366_v4, %v1111_v62  ;;  %v870_v62 = vsub.f32 %v358_v55, %v614_v56  ;;  %v1125_v4 = vmul.f32 %v869_v57, %v869_v57  ;;  %v371_v56 = vld [vmem:[%s1963_s6 + $0x468] sm:$0xff] }
 0x127   : > { %v627_v57 = vld [vmem:[%s1969_s18 + $0x468] sm:$0xff] }
 0x128   : > { %v1368_v14 = vadd.f32 %v1367_v9, %v1112_v3  ;;  %v871_v3 = vsub.f32 %v359_v60, %v615_v61  ;;  %v1126_v9 = vmul.f32 %v870_v62, %v870_v62  ;;  %v372_v61 = vld [vmem:[%s1963_s6 + $0x470] sm:$0xff] }
 0x129   : > { %v628_v62 = vld [vmem:[%s1969_s18 + $0x470] sm:$0xff] }
 0x12a   : > { %v1369_v19 = vadd.f32 %v1368_v14, %v1113_v8  ;;  %v872_v8 = vsub.f32 %v360_v1, %v616_v2  ;;  %v1127_v14 = vmul.f32 %v871_v3, %v871_v3  ;;  %v373_v2 = vld [vmem:[%s1963_s6 + $0x478] sm:$0xff] }
 0x12b   : > { %v629_v3 = vld [vmem:[%s1969_s18 + $0x478] sm:$0xff] }
 0x12c   : > { %v1370_v24 = vadd.f32 %v1369_v19, %v1114_v13  ;;  %v873_v13 = vsub.f32 %v361_v6, %v617_v7  ;;  %v1128_v19 = vmul.f32 %v872_v8, %v872_v8  ;;  %v374_v7 = vld [vmem:[%s1963_s6 + $0x480] sm:$0xff] }
 0x12d   : > { %v630_v8 = vld [vmem:[%s1969_s18 + $0x480] sm:$0xff] }
 0x12e   : > { %v1371_v29 = vadd.f32 %v1370_v24, %v1115_v18  ;;  %v874_v18 = vsub.f32 %v362_v11, %v618_v12  ;;  %v1129_v24 = vmul.f32 %v873_v13, %v873_v13  ;;  %v375_v12 = vld [vmem:[%s1963_s6 + $0x488] sm:$0xff] }
 0x12f   : > { %v631_v13 = vld [vmem:[%s1969_s18 + $0x488] sm:$0xff] }
 0x130   : > { %v1372_v34 = vadd.f32 %v1371_v29, %v1116_v23  ;;  %v875_v23 = vsub.f32 %v363_v16, %v619_v17  ;;  %v1130_v29 = vmul.f32 %v874_v18, %v874_v18  ;;  %v376_v17 = vld [vmem:[%s1963_s6 + $0x490] sm:$0xff] }
 0x131   : > { %v632_v18 = vld [vmem:[%s1969_s18 + $0x490] sm:$0xff] }
 0x132   : > { %v1373_v39 = vadd.f32 %v1372_v34, %v1117_v28  ;;  %v876_v28 = vsub.f32 %v364_v21, %v620_v22  ;;  %v1131_v34 = vmul.f32 %v875_v23, %v875_v23  ;;  %v377_v22 = vld [vmem:[%s1963_s6 + $0x498] sm:$0xff] }
 0x133   : > { %v633_v23 = vld [vmem:[%s1969_s18 + $0x498] sm:$0xff] }
 0x134   : > { %v1374_v44 = vadd.f32 %v1373_v39, %v1118_v33  ;;  %v877_v33 = vsub.f32 %v365_v26, %v621_v27  ;;  %v1132_v39 = vmul.f32 %v876_v28, %v876_v28  ;;  %v378_v27 = vld [vmem:[%s1963_s6 + $0x4a0] sm:$0xff] }
 0x135   : > { %v634_v28 = vld [vmem:[%s1969_s18 + $0x4a0] sm:$0xff] }
 0x136   : > { %v1375_v49 = vadd.f32 %v1374_v44, %v1119_v38  ;;  %v878_v38 = vsub.f32 %v366_v31, %v622_v32  ;;  %v1133_v44 = vmul.f32 %v877_v33, %v877_v33  ;;  %v379_v32 = vld [vmem:[%s1963_s6 + $0x4a8] sm:$0xff] }
 0x137   : > { %v635_v33 = vld [vmem:[%s1969_s18 + $0x4a8] sm:$0xff] }
 0x138   : > { %v1376_v54 = vadd.f32 %v1375_v49, %v1120_v43  ;;  %v879_v43 = vsub.f32 %v367_v36, %v623_v37  ;;  %v1134_v49 = vmul.f32 %v878_v38, %v878_v38  ;;  %v380_v37 = vld [vmem:[%s1963_s6 + $0x4b0] sm:$0xff] }
 0x139   : > { %v636_v38 = vld [vmem:[%s1969_s18 + $0x4b0] sm:$0xff] }
 0x13a   : > { %v1377_v59 = vadd.f32 %v1376_v54, %v1121_v48  ;;  %v880_v48 = vsub.f32 %v368_v41, %v624_v42  ;;  %v1135_v54 = vmul.f32 %v879_v43, %v879_v43  ;;  %v381_v42 = vld [vmem:[%s1963_s6 + $0x4b8] sm:$0xff] }
 0x13b   : > { %v637_v43 = vld [vmem:[%s1969_s18 + $0x4b8] sm:$0xff] }
 0x13c   : > { %v1378_v0 = vadd.f32 %v1377_v59, %v1122_v53  ;;  %v881_v53 = vsub.f32 %v369_v46, %v625_v47  ;;  %v1136_v59 = vmul.f32 %v880_v48, %v880_v48  ;;  %v382_v47 = vld [vmem:[%s1963_s6 + $0x4c0] sm:$0xff] }
 0x13d   : > { %v638_v48 = vld [vmem:[%s1969_s18 + $0x4c0] sm:$0xff] }
 0x13e   : > { %v1379_v5 = vadd.f32 %v1378_v0, %v1123_v58  ;;  %v882_v58 = vsub.f32 %v370_v51, %v626_v52  ;;  %v1137_v0 = vmul.f32 %v881_v53, %v881_v53  ;;  %v383_v52 = vld [vmem:[%s1963_s6 + $0x4c8] sm:$0xff] }
 0x13f   : > { %v639_v53 = vld [vmem:[%s1969_s18 + $0x4c8] sm:$0xff] }
 0x140   : > { %v1380_v10 = vadd.f32 %v1379_v5, %v1124_v63  ;;  %v883_v63 = vsub.f32 %v371_v56, %v627_v57  ;;  %v1138_v5 = vmul.f32 %v882_v58, %v882_v58  ;;  %v384_v57 = vld [vmem:[%s1963_s6 + $0x4d0] sm:$0xff] }
 0x141   : > { %v640_v58 = vld [vmem:[%s1969_s18 + $0x4d0] sm:$0xff] }
 0x142   : > { %v1381_v15 = vadd.f32 %v1380_v10, %v1125_v4  ;;  %v884_v4 = vsub.f32 %v372_v61, %v628_v62  ;;  %v1139_v10 = vmul.f32 %v883_v63, %v883_v63  ;;  %v385_v62 = vld [vmem:[%s1963_s6 + $0x4d8] sm:$0xff] }
 0x143   : > { %v641_v63 = vld [vmem:[%s1969_s18 + $0x4d8] sm:$0xff] }
 0x144   : > { %v1382_v20 = vadd.f32 %v1381_v15, %v1126_v9  ;;  %v885_v9 = vsub.f32 %v373_v2, %v629_v3  ;;  %v1140_v15 = vmul.f32 %v884_v4, %v884_v4  ;;  %v386_v3 = vld [vmem:[%s1963_s6 + $0x4e0] sm:$0xff] }
 0x145   : > { %v642_v4 = vld [vmem:[%s1969_s18 + $0x4e0] sm:$0xff] }
 0x146   : > { %v1383_v25 = vadd.f32 %v1382_v20, %v1127_v14  ;;  %v886_v14 = vsub.f32 %v374_v7, %v630_v8  ;;  %v1141_v20 = vmul.f32 %v885_v9, %v885_v9  ;;  %v387_v8 = vld [vmem:[%s1963_s6 + $0x4e8] sm:$0xff] }
 0x147   : > { %v643_v9 = vld [vmem:[%s1969_s18 + $0x4e8] sm:$0xff] }
 0x148   : > { %v1384_v30 = vadd.f32 %v1383_v25, %v1128_v19  ;;  %v887_v19 = vsub.f32 %v375_v12, %v631_v13  ;;  %v1142_v25 = vmul.f32 %v886_v14, %v886_v14  ;;  %v388_v13 = vld [vmem:[%s1963_s6 + $0x4f0] sm:$0xff] }
 0x149   : > { %v644_v14 = vld [vmem:[%s1969_s18 + $0x4f0] sm:$0xff] }
 0x14a   : > { %v1385_v35 = vadd.f32 %v1384_v30, %v1129_v24  ;;  %v888_v24 = vsub.f32 %v376_v17, %v632_v18  ;;  %v1143_v30 = vmul.f32 %v887_v19, %v887_v19  ;;  %v389_v18 = vld [vmem:[%s1963_s6 + $0x4f8] sm:$0xff] }
 0x14b   : > { %v645_v19 = vld [vmem:[%s1969_s18 + $0x4f8] sm:$0xff] }
 0x14c   : > { %v1386_v40 = vadd.f32 %v1385_v35, %v1130_v29  ;;  %v889_v29 = vsub.f32 %v377_v22, %v633_v23  ;;  %v1144_v35 = vmul.f32 %v888_v24, %v888_v24  ;;  %v390_v23 = vld [vmem:[%s1963_s6 + $0x500] sm:$0xff] }
 0x14d   : > { %v646_v24 = vld [vmem:[%s1969_s18 + $0x500] sm:$0xff] }
 0x14e   : > { %v1387_v45 = vadd.f32 %v1386_v40, %v1131_v34  ;;  %v890_v34 = vsub.f32 %v378_v27, %v634_v28  ;;  %v1145_v40 = vmul.f32 %v889_v29, %v889_v29  ;;  %v391_v28 = vld [vmem:[%s1963_s6 + $0x508] sm:$0xff] }
 0x14f   : > { %v647_v29 = vld [vmem:[%s1969_s18 + $0x508] sm:$0xff] }
 0x150   : > { %v1388_v50 = vadd.f32 %v1387_v45, %v1132_v39  ;;  %v891_v39 = vsub.f32 %v379_v32, %v635_v33  ;;  %v1146_v45 = vmul.f32 %v890_v34, %v890_v34  ;;  %v392_v33 = vld [vmem:[%s1963_s6 + $0x510] sm:$0xff] }
 0x151   : > { %v648_v34 = vld [vmem:[%s1969_s18 + $0x510] sm:$0xff] }
 0x152   : > { %v1389_v55 = vadd.f32 %v1388_v50, %v1133_v44  ;;  %v892_v44 = vsub.f32 %v380_v37, %v636_v38  ;;  %v1147_v50 = vmul.f32 %v891_v39, %v891_v39  ;;  %v393_v38 = vld [vmem:[%s1963_s6 + $0x518] sm:$0xff] }
 0x153   : > { %v649_v39 = vld [vmem:[%s1969_s18 + $0x518] sm:$0xff] }
 0x154   : > { %v1390_v60 = vadd.f32 %v1389_v55, %v1134_v49  ;;  %v893_v49 = vsub.f32 %v381_v42, %v637_v43  ;;  %v1148_v55 = vmul.f32 %v892_v44, %v892_v44  ;;  %v394_v43 = vld [vmem:[%s1963_s6 + $0x520] sm:$0xff] }
 0x155   : > { %v650_v44 = vld [vmem:[%s1969_s18 + $0x520] sm:$0xff] }
 0x156   : > { %v1391_v1 = vadd.f32 %v1390_v60, %v1135_v54  ;;  %v894_v54 = vsub.f32 %v382_v47, %v638_v48  ;;  %v1149_v60 = vmul.f32 %v893_v49, %v893_v49  ;;  %v395_v48 = vld [vmem:[%s1963_s6 + $0x528] sm:$0xff] }
 0x157   : > { %v651_v49 = vld [vmem:[%s1969_s18 + $0x528] sm:$0xff] }
 0x158   : > { %v1392_v6 = vadd.f32 %v1391_v1, %v1136_v59  ;;  %v895_v59 = vsub.f32 %v383_v52, %v639_v53  ;;  %v1150_v1 = vmul.f32 %v894_v54, %v894_v54  ;;  %v396_v53 = vld [vmem:[%s1963_s6 + $0x530] sm:$0xff] }
 0x159   : > { %v652_v54 = vld [vmem:[%s1969_s18 + $0x530] sm:$0xff] }
 0x15a   : > { %v1393_v11 = vadd.f32 %v1392_v6, %v1137_v0  ;;  %v896_v0 = vsub.f32 %v384_v57, %v640_v58  ;;  %v1151_v6 = vmul.f32 %v895_v59, %v895_v59  ;;  %v397_v58 = vld [vmem:[%s1963_s6 + $0x538] sm:$0xff] }
 0x15b   : > { %v653_v59 = vld [vmem:[%s1969_s18 + $0x538] sm:$0xff] }
 0x15c   : > { %v1394_v16 = vadd.f32 %v1393_v11, %v1138_v5  ;;  %v897_v5 = vsub.f32 %v385_v62, %v641_v63  ;;  %v1152_v11 = vmul.f32 %v896_v0, %v896_v0  ;;  %v398_v63 = vld [vmem:[%s1963_s6 + $0x540] sm:$0xff] }
 0x15d   : > { %v654_v0 = vld [vmem:[%s1969_s18 + $0x540] sm:$0xff] }
 0x15e   : > { %v1395_v21 = vadd.f32 %v1394_v16, %v1139_v10  ;;  %v898_v10 = vsub.f32 %v386_v3, %v642_v4  ;;  %v1153_v16 = vmul.f32 %v897_v5, %v897_v5  ;;  %v399_v4 = vld [vmem:[%s1963_s6 + $0x548] sm:$0xff] }
 0x15f   : > { %v655_v5 = vld [vmem:[%s1969_s18 + $0x548] sm:$0xff] }
 0x160   : > { %v1396_v26 = vadd.f32 %v1395_v21, %v1140_v15  ;;  %v899_v15 = vsub.f32 %v387_v8, %v643_v9  ;;  %v1154_v21 = vmul.f32 %v898_v10, %v898_v10  ;;  %v400_v9 = vld [vmem:[%s1963_s6 + $0x550] sm:$0xff] }
 0x161   : > { %v656_v10 = vld [vmem:[%s1969_s18 + $0x550] sm:$0xff] }
 0x162   : > { %v1397_v31 = vadd.f32 %v1396_v26, %v1141_v20  ;;  %v900_v20 = vsub.f32 %v388_v13, %v644_v14  ;;  %v1155_v26 = vmul.f32 %v899_v15, %v899_v15  ;;  %v401_v14 = vld [vmem:[%s1963_s6 + $0x558] sm:$0xff] }
 0x163   : > { %v657_v15 = vld [vmem:[%s1969_s18 + $0x558] sm:$0xff] }
 0x164   : > { %v1398_v36 = vadd.f32 %v1397_v31, %v1142_v25  ;;  %v901_v25 = vsub.f32 %v389_v18, %v645_v19  ;;  %v1156_v31 = vmul.f32 %v900_v20, %v900_v20  ;;  %v402_v19 = vld [vmem:[%s1963_s6 + $0x560] sm:$0xff] }
 0x165   : > { %v658_v20 = vld [vmem:[%s1969_s18 + $0x560] sm:$0xff] }
 0x166   : > { %v1399_v41 = vadd.f32 %v1398_v36, %v1143_v30  ;;  %v902_v30 = vsub.f32 %v390_v23, %v646_v24  ;;  %v1157_v36 = vmul.f32 %v901_v25, %v901_v25  ;;  %v403_v24 = vld [vmem:[%s1963_s6 + $0x568] sm:$0xff] }
 0x167   : > { %v659_v25 = vld [vmem:[%s1969_s18 + $0x568] sm:$0xff] }
 0x168   : > { %v1400_v46 = vadd.f32 %v1399_v41, %v1144_v35  ;;  %v903_v35 = vsub.f32 %v391_v28, %v647_v29  ;;  %v1158_v41 = vmul.f32 %v902_v30, %v902_v30  ;;  %v404_v29 = vld [vmem:[%s1963_s6 + $0x570] sm:$0xff] }
 0x169   : > { %v660_v30 = vld [vmem:[%s1969_s18 + $0x570] sm:$0xff] }
 0x16a   : > { %v1401_v51 = vadd.f32 %v1400_v46, %v1145_v40  ;;  %v904_v40 = vsub.f32 %v392_v33, %v648_v34  ;;  %v1159_v46 = vmul.f32 %v903_v35, %v903_v35  ;;  %v405_v34 = vld [vmem:[%s1963_s6 + $0x578] sm:$0xff] }
 0x16b   : > { %v661_v35 = vld [vmem:[%s1969_s18 + $0x578] sm:$0xff] }
 0x16c   : > { %v1402_v56 = vadd.f32 %v1401_v51, %v1146_v45  ;;  %v905_v45 = vsub.f32 %v393_v38, %v649_v39  ;;  %v1160_v51 = vmul.f32 %v904_v40, %v904_v40  ;;  %v406_v39 = vld [vmem:[%s1963_s6 + $0x580] sm:$0xff] }
 0x16d   : > { %v662_v40 = vld [vmem:[%s1969_s18 + $0x580] sm:$0xff] }
 0x16e   : > { %v1403_v61 = vadd.f32 %v1402_v56, %v1147_v50  ;;  %v906_v50 = vsub.f32 %v394_v43, %v650_v44  ;;  %v1161_v56 = vmul.f32 %v905_v45, %v905_v45  ;;  %v407_v44 = vld [vmem:[%s1963_s6 + $0x588] sm:$0xff] }
 0x16f   : > { %v663_v45 = vld [vmem:[%s1969_s18 + $0x588] sm:$0xff] }
 0x170   : > { %v1404_v2 = vadd.f32 %v1403_v61, %v1148_v55  ;;  %v907_v55 = vsub.f32 %v395_v48, %v651_v49  ;;  %v1162_v61 = vmul.f32 %v906_v50, %v906_v50  ;;  %v408_v49 = vld [vmem:[%s1963_s6 + $0x590] sm:$0xff] }
 0x171   : > { %v664_v50 = vld [vmem:[%s1969_s18 + $0x590] sm:$0xff] }
 0x172   : > { %v1405_v7 = vadd.f32 %v1404_v2, %v1149_v60  ;;  %v908_v60 = vsub.f32 %v396_v53, %v652_v54  ;;  %v1163_v2 = vmul.f32 %v907_v55, %v907_v55  ;;  %v409_v54 = vld [vmem:[%s1963_s6 + $0x598] sm:$0xff] }
 0x173   : > { %v665_v55 = vld [vmem:[%s1969_s18 + $0x598] sm:$0xff] }
 0x174   : > { %v1406_v12 = vadd.f32 %v1405_v7, %v1150_v1  ;;  %v909_v1 = vsub.f32 %v397_v58, %v653_v59  ;;  %v1164_v7 = vmul.f32 %v908_v60, %v908_v60  ;;  %v410_v59 = vld [vmem:[%s1963_s6 + $0x5a0] sm:$0xff] }
 0x175   : > { %v666_v60 = vld [vmem:[%s1969_s18 + $0x5a0] sm:$0xff] }
 0x176   : > { %v1407_v17 = vadd.f32 %v1406_v12, %v1151_v6  ;;  %v910_v6 = vsub.f32 %v398_v63, %v654_v0  ;;  %v1165_v12 = vmul.f32 %v909_v1, %v909_v1  ;;  %v411_v0 = vld [vmem:[%s1963_s6 + $0x5a8] sm:$0xff] }
 0x177   : > { %v667_v1 = vld [vmem:[%s1969_s18 + $0x5a8] sm:$0xff] }
 0x178   : > { %v1408_v22 = vadd.f32 %v1407_v17, %v1152_v11  ;;  %v911_v11 = vsub.f32 %v399_v4, %v655_v5  ;;  %v1166_v17 = vmul.f32 %v910_v6, %v910_v6  ;;  %v412_v5 = vld [vmem:[%s1963_s6 + $0x5b0] sm:$0xff] }
 0x179   : > { %v668_v6 = vld [vmem:[%s1969_s18 + $0x5b0] sm:$0xff] }
 0x17a   : > { %v1409_v27 = vadd.f32 %v1408_v22, %v1153_v16  ;;  %v912_v16 = vsub.f32 %v400_v9, %v656_v10  ;;  %v1167_v22 = vmul.f32 %v911_v11, %v911_v11  ;;  %v413_v10 = vld [vmem:[%s1963_s6 + $0x5b8] sm:$0xff] }
 0x17b   : > { %v669_v11 = vld [vmem:[%s1969_s18 + $0x5b8] sm:$0xff] }
 0x17c   : > { %v1410_v32 = vadd.f32 %v1409_v27, %v1154_v21  ;;  %v913_v21 = vsub.f32 %v401_v14, %v657_v15  ;;  %v1168_v27 = vmul.f32 %v912_v16, %v912_v16  ;;  %v414_v15 = vld [vmem:[%s1963_s6 + $0x5c0] sm:$0xff] }
 0x17d   : > { %v670_v16 = vld [vmem:[%s1969_s18 + $0x5c0] sm:$0xff] }
 0x17e   : > { %v1411_v37 = vadd.f32 %v1410_v32, %v1155_v26  ;;  %v914_v26 = vsub.f32 %v402_v19, %v658_v20  ;;  %v1169_v32 = vmul.f32 %v913_v21, %v913_v21  ;;  %v415_v20 = vld [vmem:[%s1963_s6 + $0x5c8] sm:$0xff] }
 0x17f   : > { %v671_v21 = vld [vmem:[%s1969_s18 + $0x5c8] sm:$0xff] }
 0x180   : > { %v1412_v42 = vadd.f32 %v1411_v37, %v1156_v31  ;;  %v915_v31 = vsub.f32 %v403_v24, %v659_v25  ;;  %v1170_v37 = vmul.f32 %v914_v26, %v914_v26  ;;  %v416_v25 = vld [vmem:[%s1963_s6 + $0x5d0] sm:$0xff] }
 0x181   : > { %v672_v26 = vld [vmem:[%s1969_s18 + $0x5d0] sm:$0xff] }
 0x182   : > { %v1413_v47 = vadd.f32 %v1412_v42, %v1157_v36  ;;  %v916_v36 = vsub.f32 %v404_v29, %v660_v30  ;;  %v1171_v42 = vmul.f32 %v915_v31, %v915_v31  ;;  %v417_v30 = vld [vmem:[%s1963_s6 + $0x5d8] sm:$0xff] }
 0x183   : > { %v673_v31 = vld [vmem:[%s1969_s18 + $0x5d8] sm:$0xff] }
 0x184   : > { %v1414_v52 = vadd.f32 %v1413_v47, %v1158_v41  ;;  %v917_v41 = vsub.f32 %v405_v34, %v661_v35  ;;  %v1172_v47 = vmul.f32 %v916_v36, %v916_v36  ;;  %v418_v35 = vld [vmem:[%s1963_s6 + $0x5e0] sm:$0xff] }
 0x185   : > { %v674_v36 = vld [vmem:[%s1969_s18 + $0x5e0] sm:$0xff] }
 0x186   : > { %v1415_v57 = vadd.f32 %v1414_v52, %v1159_v46  ;;  %v918_v46 = vsub.f32 %v406_v39, %v662_v40  ;;  %v1173_v52 = vmul.f32 %v917_v41, %v917_v41  ;;  %v419_v40 = vld [vmem:[%s1963_s6 + $0x5e8] sm:$0xff] }
 0x187   : > { %v675_v41 = vld [vmem:[%s1969_s18 + $0x5e8] sm:$0xff] }
 0x188   : > { %v1416_v62 = vadd.f32 %v1415_v57, %v1160_v51  ;;  %v919_v51 = vsub.f32 %v407_v44, %v663_v45  ;;  %v1174_v57 = vmul.f32 %v918_v46, %v918_v46  ;;  %v420_v45 = vld [vmem:[%s1963_s6 + $0x5f0] sm:$0xff] }
 0x189   : > { %v676_v46 = vld [vmem:[%s1969_s18 + $0x5f0] sm:$0xff] }
 0x18a   : > { %v1417_v3 = vadd.f32 %v1416_v62, %v1161_v56  ;;  %v920_v56 = vsub.f32 %v408_v49, %v664_v50  ;;  %v1175_v62 = vmul.f32 %v919_v51, %v919_v51  ;;  %v421_v50 = vld [vmem:[%s1963_s6 + $0x5f8] sm:$0xff] }
 0x18b   : > { %v677_v51 = vld [vmem:[%s1969_s18 + $0x5f8] sm:$0xff] }
 0x18c   : > { %v1418_v8 = vadd.f32 %v1417_v3, %v1162_v61  ;;  %v921_v61 = vsub.f32 %v409_v54, %v665_v55  ;;  %v1176_v3 = vmul.f32 %v920_v56, %v920_v56  ;;  %v422_v55 = vld [vmem:[%s1963_s6 + $0x600] sm:$0xff] }
 0x18d   : > { %v678_v56 = vld [vmem:[%s1969_s18 + $0x600] sm:$0xff] }
 0x18e   : > { %v1419_v13 = vadd.f32 %v1418_v8, %v1163_v2  ;;  %v922_v2 = vsub.f32 %v410_v59, %v666_v60  ;;  %v1177_v8 = vmul.f32 %v921_v61, %v921_v61  ;;  %v423_v60 = vld [vmem:[%s1963_s6 + $0x608] sm:$0xff] }
 0x18f   : > { %v679_v61 = vld [vmem:[%s1969_s18 + $0x608] sm:$0xff] }
 0x190   : > { %v1420_v18 = vadd.f32 %v1419_v13, %v1164_v7  ;;  %v923_v7 = vsub.f32 %v411_v0, %v667_v1  ;;  %v1178_v13 = vmul.f32 %v922_v2, %v922_v2  ;;  %v424_v1 = vld [vmem:[%s1963_s6 + $0x610] sm:$0xff] }
 0x191   : > { %v680_v2 = vld [vmem:[%s1969_s18 + $0x610] sm:$0xff] }
 0x192   : > { %v1421_v23 = vadd.f32 %v1420_v18, %v1165_v12  ;;  %v924_v12 = vsub.f32 %v412_v5, %v668_v6  ;;  %v1179_v18 = vmul.f32 %v923_v7, %v923_v7  ;;  %v425_v6 = vld [vmem:[%s1963_s6 + $0x618] sm:$0xff] }
 0x193   : > { %v681_v7 = vld [vmem:[%s1969_s18 + $0x618] sm:$0xff] }
 0x194   : > { %v1422_v28 = vadd.f32 %v1421_v23, %v1166_v17  ;;  %v925_v17 = vsub.f32 %v413_v10, %v669_v11  ;;  %v1180_v23 = vmul.f32 %v924_v12, %v924_v12  ;;  %v426_v11 = vld [vmem:[%s1963_s6 + $0x620] sm:$0xff] }
 0x195   : > { %v682_v12 = vld [vmem:[%s1969_s18 + $0x620] sm:$0xff] }
 0x196   : > { %v1423_v33 = vadd.f32 %v1422_v28, %v1167_v22  ;;  %v926_v22 = vsub.f32 %v414_v15, %v670_v16  ;;  %v1181_v28 = vmul.f32 %v925_v17, %v925_v17  ;;  %v427_v16 = vld [vmem:[%s1963_s6 + $0x628] sm:$0xff] }
 0x197   : > { %v683_v17 = vld [vmem:[%s1969_s18 + $0x628] sm:$0xff] }
 0x198   : > { %v1424_v38 = vadd.f32 %v1423_v33, %v1168_v27  ;;  %v927_v27 = vsub.f32 %v415_v20, %v671_v21  ;;  %v1182_v33 = vmul.f32 %v926_v22, %v926_v22  ;;  %v428_v21 = vld [vmem:[%s1963_s6 + $0x630] sm:$0xff] }
 0x199   : > { %v684_v22 = vld [vmem:[%s1969_s18 + $0x630] sm:$0xff] }
 0x19a   : > { %v1425_v43 = vadd.f32 %v1424_v38, %v1169_v32  ;;  %v928_v32 = vsub.f32 %v416_v25, %v672_v26  ;;  %v1183_v38 = vmul.f32 %v927_v27, %v927_v27  ;;  %v429_v26 = vld [vmem:[%s1963_s6 + $0x638] sm:$0xff] }
 0x19b   : > { %v685_v27 = vld [vmem:[%s1969_s18 + $0x638] sm:$0xff] }
 0x19c   : > { %v1426_v48 = vadd.f32 %v1425_v43, %v1170_v37  ;;  %v929_v37 = vsub.f32 %v417_v30, %v673_v31  ;;  %v1184_v43 = vmul.f32 %v928_v32, %v928_v32  ;;  %v430_v31 = vld [vmem:[%s1963_s6 + $0x640] sm:$0xff] }
 0x19d   : > { %v686_v32 = vld [vmem:[%s1969_s18 + $0x640] sm:$0xff] }
 0x19e   : > { %v1427_v53 = vadd.f32 %v1426_v48, %v1171_v42  ;;  %v930_v42 = vsub.f32 %v418_v35, %v674_v36  ;;  %v1185_v48 = vmul.f32 %v929_v37, %v929_v37  ;;  %v431_v36 = vld [vmem:[%s1963_s6 + $0x648] sm:$0xff] }
 0x19f   : > { %v687_v37 = vld [vmem:[%s1969_s18 + $0x648] sm:$0xff] }
 0x1a0   : > { %v1428_v58 = vadd.f32 %v1427_v53, %v1172_v47  ;;  %v931_v47 = vsub.f32 %v419_v40, %v675_v41  ;;  %v1186_v53 = vmul.f32 %v930_v42, %v930_v42  ;;  %v432_v41 = vld [vmem:[%s1963_s6 + $0x650] sm:$0xff] }
 0x1a1   : > { %v688_v42 = vld [vmem:[%s1969_s18 + $0x650] sm:$0xff] }
 0x1a2   : > { %v1429_v63 = vadd.f32 %v1428_v58, %v1173_v52  ;;  %v932_v52 = vsub.f32 %v420_v45, %v676_v46  ;;  %v1187_v58 = vmul.f32 %v931_v47, %v931_v47  ;;  %v433_v46 = vld [vmem:[%s1963_s6 + $0x658] sm:$0xff] }
 0x1a3   : > { %v689_v47 = vld [vmem:[%s1969_s18 + $0x658] sm:$0xff] }
 0x1a4   : > { %v1430_v4 = vadd.f32 %v1429_v63, %v1174_v57  ;;  %v933_v57 = vsub.f32 %v421_v50, %v677_v51  ;;  %v1188_v63 = vmul.f32 %v932_v52, %v932_v52  ;;  %v434_v51 = vld [vmem:[%s1963_s6 + $0x660] sm:$0xff] }
 0x1a5   : > { %v690_v52 = vld [vmem:[%s1969_s18 + $0x660] sm:$0xff] }
 0x1a6   : > { %v1431_v9 = vadd.f32 %v1430_v4, %v1175_v62  ;;  %v934_v62 = vsub.f32 %v422_v55, %v678_v56  ;;  %v1189_v4 = vmul.f32 %v933_v57, %v933_v57  ;;  %v435_v56 = vld [vmem:[%s1963_s6 + $0x668] sm:$0xff] }
 0x1a7   : > { %v691_v57 = vld [vmem:[%s1969_s18 + $0x668] sm:$0xff] }
 0x1a8   : > { %v1432_v14 = vadd.f32 %v1431_v9, %v1176_v3  ;;  %v935_v3 = vsub.f32 %v423_v60, %v679_v61  ;;  %v1190_v9 = vmul.f32 %v934_v62, %v934_v62  ;;  %v436_v61 = vld [vmem:[%s1963_s6 + $0x670] sm:$0xff] }
 0x1a9   : > { %v692_v62 = vld [vmem:[%s1969_s18 + $0x670] sm:$0xff] }
 0x1aa   : > { %v1433_v19 = vadd.f32 %v1432_v14, %v1177_v8  ;;  %v936_v8 = vsub.f32 %v424_v1, %v680_v2  ;;  %v1191_v14 = vmul.f32 %v935_v3, %v935_v3  ;;  %v437_v2 = vld [vmem:[%s1963_s6 + $0x678] sm:$0xff] }
 0x1ab   : > { %v693_v3 = vld [vmem:[%s1969_s18 + $0x678] sm:$0xff] }
 0x1ac   : > { %v1434_v24 = vadd.f32 %v1433_v19, %v1178_v13  ;;  %v937_v13 = vsub.f32 %v425_v6, %v681_v7  ;;  %v1192_v19 = vmul.f32 %v936_v8, %v936_v8  ;;  %v438_v7 = vld [vmem:[%s1963_s6 + $0x680] sm:$0xff] }
 0x1ad   : > { %v694_v8 = vld [vmem:[%s1969_s18 + $0x680] sm:$0xff] }
 0x1ae   : > { %v1435_v29 = vadd.f32 %v1434_v24, %v1179_v18  ;;  %v938_v18 = vsub.f32 %v426_v11, %v682_v12  ;;  %v1193_v24 = vmul.f32 %v937_v13, %v937_v13  ;;  %v439_v12 = vld [vmem:[%s1963_s6 + $0x688] sm:$0xff] }
 0x1af   : > { %v695_v13 = vld [vmem:[%s1969_s18 + $0x688] sm:$0xff] }
 0x1b0   : > { %v1436_v34 = vadd.f32 %v1435_v29, %v1180_v23  ;;  %v939_v23 = vsub.f32 %v427_v16, %v683_v17  ;;  %v1194_v29 = vmul.f32 %v938_v18, %v938_v18  ;;  %v440_v17 = vld [vmem:[%s1963_s6 + $0x690] sm:$0xff] }
 0x1b1   : > { %v696_v18 = vld [vmem:[%s1969_s18 + $0x690] sm:$0xff] }
 0x1b2   : > { %v1437_v39 = vadd.f32 %v1436_v34, %v1181_v28  ;;  %v940_v28 = vsub.f32 %v428_v21, %v684_v22  ;;  %v1195_v34 = vmul.f32 %v939_v23, %v939_v23  ;;  %v441_v22 = vld [vmem:[%s1963_s6 + $0x698] sm:$0xff] }
 0x1b3   : > { %v697_v23 = vld [vmem:[%s1969_s18 + $0x698] sm:$0xff] }
 0x1b4   : > { %v1438_v44 = vadd.f32 %v1437_v39, %v1182_v33  ;;  %v941_v33 = vsub.f32 %v429_v26, %v685_v27  ;;  %v1196_v39 = vmul.f32 %v940_v28, %v940_v28  ;;  %v442_v27 = vld [vmem:[%s1963_s6 + $0x6a0] sm:$0xff] }
 0x1b5   : > { %v698_v28 = vld [vmem:[%s1969_s18 + $0x6a0] sm:$0xff] }
 0x1b6   : > { %v1439_v49 = vadd.f32 %v1438_v44, %v1183_v38  ;;  %v942_v38 = vsub.f32 %v430_v31, %v686_v32  ;;  %v1197_v44 = vmul.f32 %v941_v33, %v941_v33  ;;  %v443_v32 = vld [vmem:[%s1963_s6 + $0x6a8] sm:$0xff] }
 0x1b7   : > { %v699_v33 = vld [vmem:[%s1969_s18 + $0x6a8] sm:$0xff] }
 0x1b8   : > { %v1440_v54 = vadd.f32 %v1439_v49, %v1184_v43  ;;  %v943_v43 = vsub.f32 %v431_v36, %v687_v37  ;;  %v1198_v49 = vmul.f32 %v942_v38, %v942_v38  ;;  %v444_v37 = vld [vmem:[%s1963_s6 + $0x6b0] sm:$0xff] }
 0x1b9   : > { %v700_v38 = vld [vmem:[%s1969_s18 + $0x6b0] sm:$0xff] }
 0x1ba   : > { %v1441_v59 = vadd.f32 %v1440_v54, %v1185_v48  ;;  %v944_v48 = vsub.f32 %v432_v41, %v688_v42  ;;  %v1199_v54 = vmul.f32 %v943_v43, %v943_v43  ;;  %v445_v42 = vld [vmem:[%s1963_s6 + $0x6b8] sm:$0xff] }
 0x1bb   : > { %v701_v43 = vld [vmem:[%s1969_s18 + $0x6b8] sm:$0xff] }
 0x1bc   : > { %v1442_v0 = vadd.f32 %v1441_v59, %v1186_v53  ;;  %v945_v53 = vsub.f32 %v433_v46, %v689_v47  ;;  %v1200_v59 = vmul.f32 %v944_v48, %v944_v48  ;;  %v446_v47 = vld [vmem:[%s1963_s6 + $0x6c0] sm:$0xff] }
 0x1bd   : > { %v702_v48 = vld [vmem:[%s1969_s18 + $0x6c0] sm:$0xff] }
 0x1be   : > { %v1443_v5 = vadd.f32 %v1442_v0, %v1187_v58  ;;  %v946_v58 = vsub.f32 %v434_v51, %v690_v52  ;;  %v1201_v0 = vmul.f32 %v945_v53, %v945_v53  ;;  %v447_v52 = vld [vmem:[%s1963_s6 + $0x6c8] sm:$0xff] }
 0x1bf   : > { %v703_v53 = vld [vmem:[%s1969_s18 + $0x6c8] sm:$0xff] }
 0x1c0   : > { %v1444_v10 = vadd.f32 %v1443_v5, %v1188_v63  ;;  %v947_v63 = vsub.f32 %v435_v56, %v691_v57  ;;  %v1202_v5 = vmul.f32 %v946_v58, %v946_v58  ;;  %v448_v57 = vld [vmem:[%s1963_s6 + $0x6d0] sm:$0xff] }
 0x1c1   : > { %v704_v58 = vld [vmem:[%s1969_s18 + $0x6d0] sm:$0xff] }
 0x1c2   : > { %v1445_v15 = vadd.f32 %v1444_v10, %v1189_v4  ;;  %v948_v4 = vsub.f32 %v436_v61, %v692_v62  ;;  %v1203_v10 = vmul.f32 %v947_v63, %v947_v63  ;;  %v449_v62 = vld [vmem:[%s1963_s6 + $0x6d8] sm:$0xff] }
 0x1c3   : > { %v705_v63 = vld [vmem:[%s1969_s18 + $0x6d8] sm:$0xff] }
 0x1c4   : > { %v1446_v20 = vadd.f32 %v1445_v15, %v1190_v9  ;;  %v949_v9 = vsub.f32 %v437_v2, %v693_v3  ;;  %v1204_v15 = vmul.f32 %v948_v4, %v948_v4  ;;  %v450_v3 = vld [vmem:[%s1963_s6 + $0x6e0] sm:$0xff] }
 0x1c5   : > { %v706_v4 = vld [vmem:[%s1969_s18 + $0x6e0] sm:$0xff] }
 0x1c6   : > { %v1447_v25 = vadd.f32 %v1446_v20, %v1191_v14  ;;  %v950_v14 = vsub.f32 %v438_v7, %v694_v8  ;;  %v1205_v20 = vmul.f32 %v949_v9, %v949_v9  ;;  %v451_v8 = vld [vmem:[%s1963_s6 + $0x6e8] sm:$0xff] }
 0x1c7   : > { %v707_v9 = vld [vmem:[%s1969_s18 + $0x6e8] sm:$0xff] }
 0x1c8   : > { %v1448_v30 = vadd.f32 %v1447_v25, %v1192_v19  ;;  %v951_v19 = vsub.f32 %v439_v12, %v695_v13  ;;  %v1206_v25 = vmul.f32 %v950_v14, %v950_v14  ;;  %v452_v13 = vld [vmem:[%s1963_s6 + $0x6f0] sm:$0xff] }
 0x1c9   : > { %v708_v14 = vld [vmem:[%s1969_s18 + $0x6f0] sm:$0xff] }
 0x1ca   : > { %v1449_v35 = vadd.f32 %v1448_v30, %v1193_v24  ;;  %v952_v24 = vsub.f32 %v440_v17, %v696_v18  ;;  %v1207_v30 = vmul.f32 %v951_v19, %v951_v19  ;;  %v453_v18 = vld [vmem:[%s1963_s6 + $0x6f8] sm:$0xff] }
 0x1cb   : > { %v709_v19 = vld [vmem:[%s1969_s18 + $0x6f8] sm:$0xff] }
 0x1cc   : > { %v1450_v40 = vadd.f32 %v1449_v35, %v1194_v29  ;;  %v953_v29 = vsub.f32 %v441_v22, %v697_v23  ;;  %v1208_v35 = vmul.f32 %v952_v24, %v952_v24  ;;  %v454_v23 = vld [vmem:[%s1963_s6 + $0x700] sm:$0xff] }
 0x1cd   : > { %v710_v24 = vld [vmem:[%s1969_s18 + $0x700] sm:$0xff] }
 0x1ce   : > { %v1451_v45 = vadd.f32 %v1450_v40, %v1195_v34  ;;  %v954_v34 = vsub.f32 %v442_v27, %v698_v28  ;;  %v1209_v40 = vmul.f32 %v953_v29, %v953_v29  ;;  %v455_v28 = vld [vmem:[%s1963_s6 + $0x708] sm:$0xff] }
 0x1cf   : > { %v711_v29 = vld [vmem:[%s1969_s18 + $0x708] sm:$0xff] }
 0x1d0   : > { %v1452_v50 = vadd.f32 %v1451_v45, %v1196_v39  ;;  %v955_v39 = vsub.f32 %v443_v32, %v699_v33  ;;  %v1210_v45 = vmul.f32 %v954_v34, %v954_v34  ;;  %v456_v33 = vld [vmem:[%s1963_s6 + $0x710] sm:$0xff] }
 0x1d1   : > { %v712_v34 = vld [vmem:[%s1969_s18 + $0x710] sm:$0xff] }
 0x1d2   : > { %v1453_v55 = vadd.f32 %v1452_v50, %v1197_v44  ;;  %v956_v44 = vsub.f32 %v444_v37, %v700_v38  ;;  %v1211_v50 = vmul.f32 %v955_v39, %v955_v39  ;;  %v457_v38 = vld [vmem:[%s1963_s6 + $0x718] sm:$0xff] }
 0x1d3   : > { %v713_v39 = vld [vmem:[%s1969_s18 + $0x718] sm:$0xff] }
 0x1d4   : > { %v1454_v60 = vadd.f32 %v1453_v55, %v1198_v49  ;;  %v957_v49 = vsub.f32 %v445_v42, %v701_v43  ;;  %v1212_v55 = vmul.f32 %v956_v44, %v956_v44  ;;  %v458_v43 = vld [vmem:[%s1963_s6 + $0x720] sm:$0xff] }
 0x1d5   : > { %v714_v44 = vld [vmem:[%s1969_s18 + $0x720] sm:$0xff] }
 0x1d6   : > { %v1455_v1 = vadd.f32 %v1454_v60, %v1199_v54  ;;  %v958_v54 = vsub.f32 %v446_v47, %v702_v48  ;;  %v1213_v60 = vmul.f32 %v957_v49, %v957_v49  ;;  %v459_v48 = vld [vmem:[%s1963_s6 + $0x728] sm:$0xff] }
 0x1d7   : > { %v715_v49 = vld [vmem:[%s1969_s18 + $0x728] sm:$0xff] }
 0x1d8   : > { %v1456_v6 = vadd.f32 %v1455_v1, %v1200_v59  ;;  %v959_v59 = vsub.f32 %v447_v52, %v703_v53  ;;  %v1214_v1 = vmul.f32 %v958_v54, %v958_v54  ;;  %v460_v53 = vld [vmem:[%s1963_s6 + $0x730] sm:$0xff] }
 0x1d9   : > { %v716_v54 = vld [vmem:[%s1969_s18 + $0x730] sm:$0xff] }
 0x1da   : > { %v1457_v11 = vadd.f32 %v1456_v6, %v1201_v0  ;;  %v960_v0 = vsub.f32 %v448_v57, %v704_v58  ;;  %v1215_v6 = vmul.f32 %v959_v59, %v959_v59  ;;  %v461_v58 = vld [vmem:[%s1963_s6 + $0x738] sm:$0xff] }
 0x1db   : > { %v717_v59 = vld [vmem:[%s1969_s18 + $0x738] sm:$0xff] }
 0x1dc   : > { %v1458_v16 = vadd.f32 %v1457_v11, %v1202_v5  ;;  %v961_v5 = vsub.f32 %v449_v62, %v705_v63  ;;  %v1216_v11 = vmul.f32 %v960_v0, %v960_v0  ;;  %v462_v63 = vld [vmem:[%s1963_s6 + $0x740] sm:$0xff] }
 0x1dd   : > { %v718_v0 = vld [vmem:[%s1969_s18 + $0x740] sm:$0xff] }
 0x1de   : > { %v1459_v21 = vadd.f32 %v1458_v16, %v1203_v10  ;;  %v962_v10 = vsub.f32 %v450_v3, %v706_v4  ;;  %v1217_v16 = vmul.f32 %v961_v5, %v961_v5  ;;  %v463_v4 = vld [vmem:[%s1963_s6 + $0x748] sm:$0xff] }
 0x1df   : > { %v719_v5 = vld [vmem:[%s1969_s18 + $0x748] sm:$0xff] }
 0x1e0   : > { %v1460_v26 = vadd.f32 %v1459_v21, %v1204_v15  ;;  %v963_v15 = vsub.f32 %v451_v8, %v707_v9  ;;  %v1218_v21 = vmul.f32 %v962_v10, %v962_v10  ;;  %v464_v9 = vld [vmem:[%s1963_s6 + $0x750] sm:$0xff] }
 0x1e1   : > { %v720_v10 = vld [vmem:[%s1969_s18 + $0x750] sm:$0xff] }
 0x1e2   : > { %v1461_v31 = vadd.f32 %v1460_v26, %v1205_v20  ;;  %v964_v20 = vsub.f32 %v452_v13, %v708_v14  ;;  %v1219_v26 = vmul.f32 %v963_v15, %v963_v15  ;;  %v465_v14 = vld [vmem:[%s1963_s6 + $0x758] sm:$0xff] }
 0x1e3   : > { %v721_v15 = vld [vmem:[%s1969_s18 + $0x758] sm:$0xff] }
 0x1e4   : > { %v1462_v36 = vadd.f32 %v1461_v31, %v1206_v25  ;;  %v965_v25 = vsub.f32 %v453_v18, %v709_v19  ;;  %v1220_v31 = vmul.f32 %v964_v20, %v964_v20  ;;  %v466_v19 = vld [vmem:[%s1963_s6 + $0x760] sm:$0xff] }
 0x1e5   : > { %v722_v20 = vld [vmem:[%s1969_s18 + $0x760] sm:$0xff] }
 0x1e6   : > { %v1463_v41 = vadd.f32 %v1462_v36, %v1207_v30  ;;  %v966_v30 = vsub.f32 %v454_v23, %v710_v24  ;;  %v1221_v36 = vmul.f32 %v965_v25, %v965_v25  ;;  %v467_v24 = vld [vmem:[%s1963_s6 + $0x768] sm:$0xff] }
 0x1e7   : > { %v723_v25 = vld [vmem:[%s1969_s18 + $0x768] sm:$0xff] }
 0x1e8   : > { %v1464_v46 = vadd.f32 %v1463_v41, %v1208_v35  ;;  %v967_v35 = vsub.f32 %v455_v28, %v711_v29  ;;  %v1222_v41 = vmul.f32 %v966_v30, %v966_v30  ;;  %v468_v29 = vld [vmem:[%s1963_s6 + $0x770] sm:$0xff] }
 0x1e9   : > { %v724_v30 = vld [vmem:[%s1969_s18 + $0x770] sm:$0xff] }
 0x1ea   : > { %v1465_v51 = vadd.f32 %v1464_v46, %v1209_v40  ;;  %v968_v40 = vsub.f32 %v456_v33, %v712_v34  ;;  %v1223_v46 = vmul.f32 %v967_v35, %v967_v35  ;;  %v469_v34 = vld [vmem:[%s1963_s6 + $0x778] sm:$0xff] }
 0x1eb   : > { %v725_v35 = vld [vmem:[%s1969_s18 + $0x778] sm:$0xff] }
 0x1ec   : > { %v1466_v56 = vadd.f32 %v1465_v51, %v1210_v45  ;;  %v969_v45 = vsub.f32 %v457_v38, %v713_v39  ;;  %v1224_v51 = vmul.f32 %v968_v40, %v968_v40  ;;  %v470_v39 = vld [vmem:[%s1963_s6 + $0x780] sm:$0xff] }
 0x1ed   : > { %v726_v40 = vld [vmem:[%s1969_s18 + $0x780] sm:$0xff] }
 0x1ee   : > { %v1467_v61 = vadd.f32 %v1466_v56, %v1211_v50  ;;  %v970_v50 = vsub.f32 %v458_v43, %v714_v44  ;;  %v1225_v56 = vmul.f32 %v969_v45, %v969_v45  ;;  %v471_v44 = vld [vmem:[%s1963_s6 + $0x788] sm:$0xff] }
 0x1ef   : > { %v727_v45 = vld [vmem:[%s1969_s18 + $0x788] sm:$0xff] }
 0x1f0   : > { %v1468_v2 = vadd.f32 %v1467_v61, %v1212_v55  ;;  %v971_v55 = vsub.f32 %v459_v48, %v715_v49  ;;  %v1226_v61 = vmul.f32 %v970_v50, %v970_v50  ;;  %v472_v49 = vld [vmem:[%s1963_s6 + $0x790] sm:$0xff] }
 0x1f1   : > { %v728_v50 = vld [vmem:[%s1969_s18 + $0x790] sm:$0xff] }
 0x1f2   : > { %v1469_v7 = vadd.f32 %v1468_v2, %v1213_v60  ;;  %v972_v60 = vsub.f32 %v460_v53, %v716_v54  ;;  %v1227_v2 = vmul.f32 %v971_v55, %v971_v55  ;;  %v473_v54 = vld [vmem:[%s1963_s6 + $0x798] sm:$0xff] }
 0x1f3   : > { %v729_v55 = vld [vmem:[%s1969_s18 + $0x798] sm:$0xff] }
 0x1f4   : > { %v1470_v12 = vadd.f32 %v1469_v7, %v1214_v1  ;;  %v973_v1 = vsub.f32 %v461_v58, %v717_v59  ;;  %v1228_v7 = vmul.f32 %v972_v60, %v972_v60  ;;  %v474_v59 = vld [vmem:[%s1963_s6 + $0x7a0] sm:$0xff] }
 0x1f5   : > { %v730_v60 = vld [vmem:[%s1969_s18 + $0x7a0] sm:$0xff] }
 0x1f6   : > { %v1471_v17 = vadd.f32 %v1470_v12, %v1215_v6  ;;  %v974_v6 = vsub.f32 %v462_v63, %v718_v0  ;;  %v1229_v12 = vmul.f32 %v973_v1, %v973_v1  ;;  %v475_v0 = vld [vmem:[%s1963_s6 + $0x7a8] sm:$0xff] }
 0x1f7   : > { %v731_v1 = vld [vmem:[%s1969_s18 + $0x7a8] sm:$0xff] }
 0x1f8   : > { %v1472_v22 = vadd.f32 %v1471_v17, %v1216_v11  ;;  %v975_v11 = vsub.f32 %v463_v4, %v719_v5  ;;  %v1230_v17 = vmul.f32 %v974_v6, %v974_v6  ;;  %v476_v5 = vld [vmem:[%s1963_s6 + $0x7b0] sm:$0xff] }
 0x1f9   : > { %v732_v6 = vld [vmem:[%s1969_s18 + $0x7b0] sm:$0xff] }
 0x1fa   : > { %v1473_v27 = vadd.f32 %v1472_v22, %v1217_v16  ;;  %v976_v16 = vsub.f32 %v464_v9, %v720_v10  ;;  %v1231_v22 = vmul.f32 %v975_v11, %v975_v11  ;;  %v477_v10 = vld [vmem:[%s1963_s6 + $0x7b8] sm:$0xff] }
 0x1fb   : > { %v733_v11 = vld [vmem:[%s1969_s18 + $0x7b8] sm:$0xff] }
 0x1fc   : > { %v1474_v32 = vadd.f32 %v1473_v27, %v1218_v21  ;;  %v977_v21 = vsub.f32 %v465_v14, %v721_v15  ;;  %v1232_v27 = vmul.f32 %v976_v16, %v976_v16  ;;  %v478_v15 = vld [vmem:[%s1963_s6 + $0x7c0] sm:$0xff] }
 0x1fd   : > { %v734_v16 = vld [vmem:[%s1969_s18 + $0x7c0] sm:$0xff] }
 0x1fe   : > { %v1475_v37 = vadd.f32 %v1474_v32, %v1219_v26  ;;  %v978_v26 = vsub.f32 %v466_v19, %v722_v20  ;;  %v1233_v32 = vmul.f32 %v977_v21, %v977_v21  ;;  %v479_v20 = vld [vmem:[%s1963_s6 + $0x7c8] sm:$0xff] }
 0x1ff   : > { %v735_v21 = vld [vmem:[%s1969_s18 + $0x7c8] sm:$0xff] }
 0x200   : > { %v1476_v42 = vadd.f32 %v1475_v37, %v1220_v31  ;;  %v979_v31 = vsub.f32 %v467_v24, %v723_v25  ;;  %v1234_v37 = vmul.f32 %v978_v26, %v978_v26  ;;  %v480_v25 = vld [vmem:[%s1963_s6 + $0x7d0] sm:$0xff] }
 0x201   : > { %v736_v26 = vld [vmem:[%s1969_s18 + $0x7d0] sm:$0xff] }
 0x202   : > { %v1477_v47 = vadd.f32 %v1476_v42, %v1221_v36  ;;  %v980_v36 = vsub.f32 %v468_v29, %v724_v30  ;;  %v1235_v42 = vmul.f32 %v979_v31, %v979_v31  ;;  %v481_v30 = vld [vmem:[%s1963_s6 + $0x7d8] sm:$0xff] }
 0x203   : > { %v737_v31 = vld [vmem:[%s1969_s18 + $0x7d8] sm:$0xff] }
 0x204   : > { %v1478_v52 = vadd.f32 %v1477_v47, %v1222_v41  ;;  %v981_v41 = vsub.f32 %v469_v34, %v725_v35  ;;  %v1236_v47 = vmul.f32 %v980_v36, %v980_v36  ;;  %v482_v35 = vld [vmem:[%s1963_s6 + $0x7e0] sm:$0xff] }
 0x205   : > { %v738_v36 = vld [vmem:[%s1969_s18 + $0x7e0] sm:$0xff] }
 0x206   : > { %v1479_v57 = vadd.f32 %v1478_v52, %v1223_v46  ;;  %v982_v46 = vsub.f32 %v470_v39, %v726_v40  ;;  %v1237_v52 = vmul.f32 %v981_v41, %v981_v41  ;;  %v483_v40 = vld [vmem:[%s1963_s6 + $0x7e8] sm:$0xff] }
 0x207   : > { %v739_v41 = vld [vmem:[%s1969_s18 + $0x7e8] sm:$0xff] }
 0x208   : > { %v1480_v62 = vadd.f32 %v1479_v57, %v1224_v51  ;;  %v983_v51 = vsub.f32 %v471_v44, %v727_v45  ;;  %v1238_v57 = vmul.f32 %v982_v46, %v982_v46  ;;  %v484_v45 = vld [vmem:[%s1963_s6 + $0x7f0] sm:$0xff] }
 0x209   : > { %v740_v46 = vld [vmem:[%s1969_s18 + $0x7f0] sm:$0xff] }
 0x20a   : > { %v1481_v3 = vadd.f32 %v1480_v62, %v1225_v56  ;;  %v984_v56 = vsub.f32 %v472_v49, %v728_v50  ;;  %v1239_v62 = vmul.f32 %v983_v51, %v983_v51  ;;  %v485_v50 = vld [vmem:[%s1963_s6 + $0x7f8] sm:$0xff] }
 0x20b   : > { %v741_v51 = vld [vmem:[%s1969_s18 + $0x7f8] sm:$0xff] }
 0x20c   : > { %v1482_v8 = vadd.f32 %v1481_v3, %v1226_v61  ;;  %v985_v61 = vsub.f32 %v473_v54, %v729_v55  ;;  %v1240_v3 = vmul.f32 %v984_v56, %v984_v56  ;;  %v997_v55 = vsub.f32 %v485_v50, %v741_v51 }
 0x20e   : > { %v1483_v13 = vadd.f32 %v1482_v8, %v1227_v2  ;;  %v986_v2 = vsub.f32 %v474_v59, %v730_v60  ;;  %v1241_v8 = vmul.f32 %v985_v61, %v985_v61  ;;  %v1253_v60 = vmul.f32 %v997_v55, %v997_v55 }
 0x210   : > { %v1484_v18 = vadd.f32 %v1483_v13, %v1228_v7  ;;  %v987_v7 = vsub.f32 %v475_v0, %v731_v1  ;;  %v1242_v13 = vmul.f32 %v986_v2, %v986_v2 }
 0x212   : > { %v1485_v23 = vadd.f32 %v1484_v18, %v1229_v12  ;;  %v988_v12 = vsub.f32 %v476_v5, %v732_v6  ;;  %v1243_v18 = vmul.f32 %v987_v7, %v987_v7 }
 0x214   : > { %v1486_v28 = vadd.f32 %v1485_v23, %v1230_v17  ;;  %v989_v17 = vsub.f32 %v477_v10, %v733_v11  ;;  %v1244_v23 = vmul.f32 %v988_v12, %v988_v12 }
 0x216   : > { %v1487_v33 = vadd.f32 %v1486_v28, %v1231_v22  ;;  %v990_v22 = vsub.f32 %v478_v15, %v734_v16  ;;  %v1245_v28 = vmul.f32 %v989_v17, %v989_v17 }
 0x218   : > { %v1488_v38 = vadd.f32 %v1487_v33, %v1232_v27  ;;  %v991_v27 = vsub.f32 %v479_v20, %v735_v21  ;;  %v1246_v33 = vmul.f32 %v990_v22, %v990_v22 }
 0x21a   : > { %v1489_v43 = vadd.f32 %v1488_v38, %v1233_v32  ;;  %v992_v32 = vsub.f32 %v480_v25, %v736_v26  ;;  %v1247_v38 = vmul.f32 %v991_v27, %v991_v27 }
 0x21c   : > { %v1490_v48 = vadd.f32 %v1489_v43, %v1234_v37  ;;  %v993_v37 = vsub.f32 %v481_v30, %v737_v31  ;;  %v1248_v43 = vmul.f32 %v992_v32, %v992_v32 }
 0x21e   : > { %v1491_v53 = vadd.f32 %v1490_v48, %v1235_v42  ;;  %v994_v42 = vsub.f32 %v482_v35, %v738_v36  ;;  %v1249_v48 = vmul.f32 %v993_v37, %v993_v37 }
 0x220   : > { %v1492_v58 = vadd.f32 %v1491_v53, %v1236_v47  ;;  %v995_v47 = vsub.f32 %v483_v40, %v739_v41  ;;  %v1250_v53 = vmul.f32 %v994_v42, %v994_v42 }
 0x222   : > { %v1493_v63 = vadd.f32 %v1492_v58, %v1237_v52  ;;  %v996_v52 = vsub.f32 %v484_v45, %v740_v46  ;;  %v1251_v56 = vmul.f32 %v995_v47, %v995_v47 }
 0x224   : > { %v1494_v4 = vadd.f32 %v1493_v63, %v1238_v57  ;;  %v1252_v58 = vmul.f32 %v996_v52, %v996_v52  ;;  %v1254_v63 = vld [vmem:[#allocation2] sm:$0xff] }
 0x226   : > { %v1495_v9 = vadd.f32 %v1494_v4, %v1239_v62 }
 0x228   : > { %v1496_v14 = vadd.f32 %v1495_v9, %v1240_v3 }
 0x22a   : > { %v1497_v19 = vadd.f32 %v1496_v14, %v1241_v8 }
 0x22c   : > { %v1498_v24 = vadd.f32 %v1497_v19, %v1242_v13 }
 0x22e   : > { %v1499_v29 = vadd.f32 %v1498_v24, %v1243_v18 }
 0x230   : > { %v1500_v34 = vadd.f32 %v1499_v29, %v1244_v23 }
 0x232   : > { %v1501_v39 = vadd.f32 %v1500_v34, %v1245_v28 }
 0x234   : > { %v1502_v44 = vadd.f32 %v1501_v39, %v1246_v33 }
 0x236   : > { %v1503_v49 = vadd.f32 %v1502_v44, %v1247_v38 }
 0x238   : > { %v1504_v54 = vadd.f32 %v1503_v49, %v1248_v43 }
 0x23a   : > { %v1505_v57 = vadd.f32 %v1504_v54, %v1249_v48 }
 0x23c   : > { %v1506_v59 = vadd.f32 %v1505_v57, %v1250_v53 }
 0x23e   : > { %v1507_v61 = vadd.f32 %v1506_v59, %v1251_v56 }
 0x240   : > { %v1508_v62 = vadd.f32 %v1507_v61, %v1252_v58 }
 0x242   : > { %v1509_v0 = vadd.f32 %v1508_v62, %v1253_v60  ;;  %1515 = sbr.rel (%p1628_p7) target bundleno = 591 (0x24f), region = 44 }
 0x244   : > { %v1510_v1 = vadd.f32 %v1509_v0, %v1254_v63 }
 0x246   : > { %1511 = vst [vmem:[#allocation2] sm:$0xff] %v1510_v1 }
 0x24d   : > { %v1516_v2 = vld [vmem:[#allocation2] sm:$0xff] }
 0x24e   : > { %1517 = vst [vmem:[#allocation8] sm:$0xff] %v1516_v2 }
 0x24f PF: > { %p2491_p10 = scmp.eq.s32.totalorder %s1615_s15, 1  ;;  %s1850_s30 = smov [#allocation8]  }
 0x250   : > { %s1527_s8 = sshll.u32 %s1850_s30, 4  ;;  %s1528_s8 = int_to_ptr.vmem [resolvable:$true] %s1527_s8 }
 0x251   : > { %s1761_s9 = scalar_lea.vmem %s1528_s8, 128  ;;  %p1768_p6 = scmp.lt.s32.totalorder %s1528_s8, %s1528_s8 }
 0x252   : > { %p1762_p3 = scmp.ne.s32.totalorder %s1528_s8, %s1761_s9  ;;  %p1769_p8 = scmp.lt.s32.totalorder %s1761_s9, %s1761_s9 }
 0x254   : > { %p1763_p4 = pnand %p1762_p3, %p2491_p10  ;;  %p1770_p11 = por %p1769_p8, %p1768_p6 }
 0x256   : > { %p1764_p5 = pneg %p1763_p4 }
 0x258   : > { %p1771_p12 = pnand %p1770_p11, %p1764_p5 }
 0x25a   : > { %1774 = shalt.err (!%p1771_p12)
}
 0x25b   : > { %1640 = dma.vmem_to_hbm [thread:$0]  (%p2491_p10), %s1528_s8, 128, %s2526_s2, [#allocation5]  }
 0x25c   : > { %1818 = dma.done.wait (%p2491_p10), [#allocation5], 128  }
 0x25d   : > { %1820 = vsyncadd (%p2491_p10), [#allocation5], 4294967168 }
 0x25e PF: > { %s19_s14 = sadd.s32 1, %s1843_s14   ;;  %s2532_s9 = smov %s1827_s10 }
 0x25f   : > { %p16_p13 = scmp.ge.s32.totalorder %s19_s14, 4   ;;  %s2533_s10 = smov %s1831_s11 }
 0x260   : > { %s2534_s11 = smov %s1917_s21  ;;  %s2535_s12 = smov %s1839_s13 }
 0x261   : > { %s2536_s13 = smov %s2538_s16  ;;  %18 = sbr.rel (!%p16_p13) target bundleno = 7 (0x7), region = 87 }
 0x266   :  { %1540 = vsyncpa [#allocation4], 1 }
 0x267   :  { %1542 = vsyncpa [#allocation4 + $0x1], 1 }
 0x268   :  { %1543 = vsyncpa [#allocation7], 1 }
 0x269   :  { %1545 = vsyncpa [#allocation7 + $0x1], 1 }
 0x26a   :  { %1546 = vsyncpa [#allocation5], 1 }
 0x26b   :  { %1548 = vsyncpa [#allocation5 + $0x1], 1 }

</bundles_post_ra>
